<compile_context>
chip_gen: v7x
topology: tpu7x:2x2x1
jax: 0.10.0
libtpu: 0.0.40
codegen_flags: <defaults>
</compile_context>

<pallas_src>
import jax
import jax.numpy as jnp
from jax.experimental import pallas as pl
from jax.experimental.pallas import tpu as pltpu


# ----------------------------- Pallas kernel --------------------------------

def make_fused_lstm_kernel(L, T, B_TILE, H, O):
    """Kernel computing L stacked LSTM layers + final FC for one batch tile.

    Ref layout (per grid step):
      x_ref:                               (T, B_TILE, Din)      time-major, bf16
      refs[3l], refs[3l+1], refs[3l+2]:    (Din_l,4H) bf16, (H,4H) bf16, (1,4H) f32
                                           gate columns in PyTorch order [i|f|g|o]
      refs[-3], refs[-2]:                  FC weight / bias
                                           O==1: (1,H) f32 / (1,1) f32
                                           O>1 : (H,O) bf16 / (1,O) f32
      refs[-1]:                            (B_TILE, O) output, f32
    """

    def kernel(x_ref, *refs):
        out_ref = refs[-1]

        # Load all weights once; they stay resident in vregs/VMEM for the whole call.
        w_ih = [refs[3 * l][...] for l in range(L)]       # bf16
        w_hh = [refs[3 * l + 1][...] for l in range(L)]   # bf16
        bias = [refs[3 * l + 2][...] for l in range(L)]   # f32

        # Recurrent state carried as values (vregs), f32.
        h = [jnp.zeros((B_TILE, H), jnp.float32) for _ in range(L)]
        c = [jnp.zeros((B_TILE, H), jnp.float32) for _ in range(L)]

        # Wavefront-skewed loop: at global step s, layer l processes time t = s - l.
        # Layers are visited in descending order so h[l-1] still holds layer l-1's
        # output at time t (produced at global step s-1) when layer l reads it.
        for s in range(T + L - 1):
            for l in reversed(range(L)):
                t = s - l
                if not (0 <= t < T):
                    continue
                if l == 0:
                    x_in = x_ref[t]                               # (B_TILE, Din) bf16
                else:
                    x_in = h[l - 1].astype(jnp.bfloat16)          # (B_TILE, H)  bf16

                gates = (jnp.dot(x_in, w_ih[l],
                                 preferred_element_type=jnp.float32)
                         + jnp.dot(h[l].astype(jnp.bfloat16), w_hh[l],
                                   preferred_element_type=jnp.float32)
                         + bias[l])                               # (B_TILE, 4H) f32

                # Full-width sigmoid (one EUP op over the whole vreg when 4H == 128),
                # tanh only on the g slice.  Gate order is PyTorch's [i, f, g, o].
                sig = jax.nn.sigmoid(gates)
                i_g = sig[:, 0 * H:1 * H]
                f_g = sig[:, 1 * H:2 * H]
                g_g = jnp.tanh(gates[:, 2 * H:3 * H])
                o_g = sig[:, 3 * H:4 * H]

                c[l] = f_g * c[l] + i_g * g_g                     # f32 elementwise
                h[l] = o_g * jnp.tanh(c[l])

        # Final FC on the last layer's last-timestep hidden state.
        h_last = h[L - 1]                                         # (B_TILE, H) f32
        fc_w = refs[-3][...]
        fc_b = refs[-2][...]
        if O == 1:
            # VPU multiply + XLU lane reduction instead of a near-empty MXU matmul.
            out = jnp.sum(h_last * fc_w, axis=-1, keepdims=True) + fc_b
        else:
            out = jnp.dot(h_last.astype(jnp.bfloat16), fc_w,
                          preferred_element_type=jnp.float32) + fc_b
        out_ref[...] = out.astype(out_ref.dtype)

    return kernel


# ------------------------------- wrapper -------------------------------------

def _rep_spec(shape):
    """Full-array block, replicated across the batch grid axis."""
    nd = len(shape)
    return pl.BlockSpec(shape, lambda i, _nd=nd: (0,) * _nd)


def lstm_model_forward(x, params):
    """Equivalent of LSTMModel.forward: multi-layer LSTM (zero init state),
    take the last-timestep hidden state of the last layer, apply Linear."""
    B, T, Din = x.shape
    H = params["lstm"][0]["w_hh"].shape[0]
    O = params["fc_w"].shape[1]
    L = len(params["lstm"])

    # Pad batch so tiles fill the 8 sublanes; keep the whole batch in one recurrent
    # matmul up to 256 rows (MXU height on v6e/v7x), shard bigger batches across a
    # "parallel" grid axis (second TensorCore on v7x).
    Bp8 = max(8, -(-B // 8) * 8)
    B_TILE = Bp8 if Bp8 <= 256 else 256
    Bp = -(-Bp8 // B_TILE) * B_TILE
    n_tiles = Bp // B_TILE

    # Time-major, padded, bf16 (MXU operand); padded rows are inert and sliced off.
    x_t = jnp.transpose(x, (1, 0, 2)).astype(jnp.bfloat16)        # (T, B, Din)
    x_t = jnp.pad(x_t, ((0, 0), (0, Bp - B), (0, 0)))             # (T, Bp, Din)

    inputs = [x_t]
    for layer in params["lstm"]:
        inputs += [layer["w_ih"].astype(jnp.bfloat16),            # (Din_l, 4H)
                   layer["w_hh"].astype(jnp.bfloat16),            # (H, 4H)
                   layer["b"].astype(jnp.float32)]                # (1, 4H)
    if O == 1:
        inputs += [params["fc_w"].reshape(1, H).astype(jnp.float32),   # (1, H)
                   params["fc_b"].reshape(1, 1).astype(jnp.float32)]   # (1, 1)
    else:
        inputs += [params["fc_w"].astype(jnp.bfloat16),           # (H, O)
                   params["fc_b"].astype(jnp.float32)]            # (1, O)

    in_specs = [pl.BlockSpec((T, B_TILE, Din), lambda i: (0, i, 0))]
    in_specs += [_rep_spec(a.shape) for a in inputs[1:]]
    # NOTE: O=1 output forces masked stores; at 8 elements total this is negligible.

    out = pl.pallas_call(
        make_fused_lstm_kernel(L, T, B_TILE, H, O),
        out_shape=jax.ShapeDtypeStruct((Bp, O), jnp.float32),
        grid=(n_tiles,),
        in_specs=in_specs,
        out_specs=pl.BlockSpec((B_TILE, O), lambda i: (i, 0)),
        compiler_params=pltpu.CompilerParams(
            dimension_semantics=("parallel",)),
    )(*inputs)
    return out[:B]


# ------------------------- deterministic init --------------------------------

def init_params(key, input_size, hidden_size, num_layers, output_size):
    """Mimics LSTMModel._reinitialize(): xavier for weight_ih / fc.weight,
    orthogonal for weight_hh (applied in PyTorch's (4H, H) orientation),
    bias_ih = 0 with forget-gate slice = 1, bias_hh = 0.
    Gate order along the 4H axis is PyTorch's [i, f, g, o]."""
    xavier = jax.nn.initializers.glorot_uniform()
    orth = jax.nn.initializers.orthogonal()
    H = hidden_size
    layers = []
    for l in range(num_layers):
        din = input_size if l == 0 else hidden_size
        key, k1, k2 = jax.random.split(key, 3)
        w_ih = xavier(k1, (din, 4 * H), jnp.float32)              # transposed vs torch (4H, din)
        w_hh = orth(k2, (4 * H, H), jnp.float32).T                # orthogonal on torch-shaped (4H, H)
        b_ih = jnp.zeros((4 * H,), jnp.float32).at[H:2 * H].set(1.0)
        b_hh = jnp.zeros((4 * H,), jnp.float32)
        layers.append(dict(w_ih=w_ih, w_hh=w_hh,
                           b=(b_ih + b_hh).reshape(1, 4 * H)))
    key, k3 = jax.random.split(key)
    fc_w = xavier(k3, (H, output_size), jnp.float32)              # transposed vs torch (O, H)
    fc_b = jnp.zeros((1, output_size), jnp.float32)
    return dict(lstm=layers, fc_w=fc_w, fc_b=fc_b)


# --------------------------------- main ---------------------------------------

if __name__ == "__main__":
    batch, seq, input_size, hidden_size, num_layers, output_size = 2, 8, 4, 32, 2, 1

    key = jax.random.PRNGKey(0)
    pkey, xkey = jax.random.split(key)
    params = init_params(pkey, input_size, hidden_size, num_layers, output_size)

    x = jax.random.normal(xkey, (batch, seq, input_size), dtype=jnp.float32)

    y = jax.jit(lstm_model_forward)(x, params)
    y = jax.block_until_ready(y)
    assert y.shape == (batch, output_size), y.shape
    assert jnp.all(jnp.isfinite(y))
    print("KERNEL_OK")
</pallas_src>

<mosaic_0001>
module attributes {stable_mosaic.version = 11 : i64} {
  func.func @kernel(%arg0: i32, %arg1: memref<8x8x4xbf16, #tpu.memory_space<vmem>>, %arg2: memref<4x128xbf16, #tpu.memory_space<vmem>>, %arg3: memref<32x128xbf16, #tpu.memory_space<vmem>>, %arg4: memref<1x128xf32, #tpu.memory_space<vmem>>, %arg5: memref<32x128xbf16, #tpu.memory_space<vmem>>, %arg6: memref<32x128xbf16, #tpu.memory_space<vmem>>, %arg7: memref<1x128xf32, #tpu.memory_space<vmem>>, %arg8: memref<1x32xf32, #tpu.memory_space<vmem>>, %arg9: memref<1x1xf32, #tpu.memory_space<vmem>>, %arg10: memref<8x1xf32, #tpu.memory_space<vmem>>) attributes {dimension_semantics = [#tpu.dimension_semantics<parallel>], iteration_bounds = array<i64: 1>, scalar_prefetch = 0 : i64, scratch_operands = 0 : i64, tpu.core_type = #tpu.core_type<tc>, window_params = [{transform_indices = @transform_0, window_bounds = array<i64: 8, 8, 4>}, {pipeline_mode = #tpu.pipeline_mode<synchronous>, transform_indices = @transform_1, window_bounds = array<i64: 4, 128>}, {pipeline_mode = #tpu.pipeline_mode<synchronous>, transform_indices = @transform_2, window_bounds = array<i64: 32, 128>}, {pipeline_mode = #tpu.pipeline_mode<synchronous>, transform_indices = @transform_3, window_bounds = array<i64: 1, 128>}, {pipeline_mode = #tpu.pipeline_mode<synchronous>, transform_indices = @transform_4, window_bounds = array<i64: 32, 128>}, {pipeline_mode = #tpu.pipeline_mode<synchronous>, transform_indices = @transform_5, window_bounds = array<i64: 32, 128>}, {pipeline_mode = #tpu.pipeline_mode<synchronous>, transform_indices = @transform_6, window_bounds = array<i64: 1, 128>}, {pipeline_mode = #tpu.pipeline_mode<synchronous>, transform_indices = @transform_7, window_bounds = array<i64: 1, 32>}, {pipeline_mode = #tpu.pipeline_mode<synchronous>, transform_indices = @transform_8, window_bounds = array<i64: 1, 1>}, {transform_indices = @transform_9, window_bounds = array<i64: 8, 1>}]} {
    %c0 = arith.constant 0 : index
    %c0_0 = arith.constant 0 : index
    %0 = vector.load %arg2[%c0, %c0_0] : memref<4x128xbf16, #tpu.memory_space<vmem>>, vector<4x128xbf16>
    %c0_1 = arith.constant 0 : index
    %c0_2 = arith.constant 0 : index
    %1 = vector.load %arg5[%c0_1, %c0_2] : memref<32x128xbf16, #tpu.memory_space<vmem>>, vector<32x128xbf16>
    %c0_3 = arith.constant 0 : index
    %c0_4 = arith.constant 0 : index
    %2 = vector.load %arg3[%c0_3, %c0_4] : memref<32x128xbf16, #tpu.memory_space<vmem>>, vector<32x128xbf16>
    %c0_5 = arith.constant 0 : index
    %c0_6 = arith.constant 0 : index
    %3 = vector.load %arg6[%c0_5, %c0_6] : memref<32x128xbf16, #tpu.memory_space<vmem>>, vector<32x128xbf16>
    %c0_7 = arith.constant 0 : index
    %c0_8 = arith.constant 0 : index
    %4 = vector.load %arg4[%c0_7, %c0_8] : memref<1x128xf32, #tpu.memory_space<vmem>>, vector<1x128xf32>
    %c0_9 = arith.constant 0 : index
    %c0_10 = arith.constant 0 : index
    %5 = vector.load %arg7[%c0_9, %c0_10] : memref<1x128xf32, #tpu.memory_space<vmem>>, vector<1x128xf32>
    %cst = arith.constant 0.000000e+00 : f32
    %6 = vector.broadcast %cst : f32 to vector<8x32xf32>
    %cst_11 = arith.constant 0.000000e+00 : f32
    %7 = vector.broadcast %cst_11 : f32 to vector<8x32xf32>
    %cst_12 = arith.constant 0.000000e+00 : f32
    %8 = vector.broadcast %cst_12 : f32 to vector<8x32xf32>
    %cst_13 = arith.constant 0.000000e+00 : f32
    %9 = vector.broadcast %cst_13 : f32 to vector<8x32xf32>
    %c0_14 = arith.constant 0 : index
    %c0_15 = arith.constant 0 : index
    %c0_16 = arith.constant 0 : index
    %10 = vector.load %arg1[%c0_14, %c0_15, %c0_16] : memref<8x8x4xbf16, #tpu.memory_space<vmem>>, vector<1x8x4xbf16>
    %11 = vector.shape_cast %10 : vector<1x8x4xbf16> to vector<8x4xbf16>
    %cst_17 = arith.constant dense<0.000000e+00> : vector<8x128xf32>
    %12 = tpu.matmul %11, %0, %cst_17 {dimension_numbers = #tpu.dot_dimension_numbers<[1], [0], [0], [1], [0, 0, 1, 1], [], []>} : vector<8x4xbf16>, vector<4x128xbf16>, vector<8x128xf32> -> vector<8x128xf32>
    %13 = arith.truncf %6 : vector<8x32xf32> to vector<8x32xbf16>
    %cst_18 = arith.constant dense<0.000000e+00> : vector<8x128xf32>
    %14 = tpu.matmul %13, %2, %cst_18 {dimension_numbers = #tpu.dot_dimension_numbers<[1], [0], [0], [1], [0, 0, 1, 1], [], []>} : vector<8x32xbf16>, vector<32x128xbf16>, vector<8x128xf32> -> vector<8x128xf32>
    %15 = arith.addf %12, %14 : vector<8x128xf32>
    %16 = vector.broadcast %4 : vector<1x128xf32> to vector<8x128xf32>
    %17 = arith.addf %15, %16 : vector<8x128xf32>
    %18 = arith.negf %17 : vector<8x128xf32>
    %19 = math.exp %18 : vector<8x128xf32>
    %cst_19 = arith.constant 1.000000e+00 : f32
    %20 = vector.broadcast %cst_19 : f32 to vector<8x128xf32>
    %21 = arith.addf %20, %19 : vector<8x128xf32>
    %22 = arith.divf %20, %21 : vector<8x128xf32>
    %23 = vector.extract_strided_slice %22 {offsets = [0, 0], sizes = [8, 32], strides = [1, 1]} : vector<8x128xf32> to vector<8x32xf32>
    %24 = vector.extract_strided_slice %22 {offsets = [0, 32], sizes = [8, 32], strides = [1, 1]} : vector<8x128xf32> to vector<8x32xf32>
    %25 = vector.extract_strided_slice %17 {offsets = [0, 64], sizes = [8, 32], strides = [1, 1]} : vector<8x128xf32> to vector<8x32xf32>
    %26 = math.tanh %25 : vector<8x32xf32>
    %27 = vector.extract_strided_slice %22 {offsets = [0, 96], sizes = [8, 32], strides = [1, 1]} : vector<8x128xf32> to vector<8x32xf32>
    %28 = arith.mulf %24, %8 : vector<8x32xf32>
    %29 = arith.mulf %23, %26 : vector<8x32xf32>
    %30 = arith.addf %28, %29 : vector<8x32xf32>
    %31 = math.tanh %30 : vector<8x32xf32>
    %32 = arith.mulf %27, %31 : vector<8x32xf32>
    %33 = arith.truncf %32 : vector<8x32xf32> to vector<8x32xbf16>
    %cst_20 = arith.constant dense<0.000000e+00> : vector<8x128xf32>
    %34 = tpu.matmul %33, %1, %cst_20 {dimension_numbers = #tpu.dot_dimension_numbers<[1], [0], [0], [1], [0, 0, 1, 1], [], []>} : vector<8x32xbf16>, vector<32x128xbf16>, vector<8x128xf32> -> vector<8x128xf32>
    %35 = arith.truncf %7 : vector<8x32xf32> to vector<8x32xbf16>
    %cst_21 = arith.constant dense<0.000000e+00> : vector<8x128xf32>
    %36 = tpu.matmul %35, %3, %cst_21 {dimension_numbers = #tpu.dot_dimension_numbers<[1], [0], [0], [1], [0, 0, 1, 1], [], []>} : vector<8x32xbf16>, vector<32x128xbf16>, vector<8x128xf32> -> vector<8x128xf32>
    %37 = arith.addf %34, %36 : vector<8x128xf32>
    %38 = vector.broadcast %5 : vector<1x128xf32> to vector<8x128xf32>
    %39 = arith.addf %37, %38 : vector<8x128xf32>
    %40 = arith.negf %39 : vector<8x128xf32>
    %41 = math.exp %40 : vector<8x128xf32>
    %cst_22 = arith.constant 1.000000e+00 : f32
    %42 = vector.broadcast %cst_22 : f32 to vector<8x128xf32>
    %43 = arith.addf %42, %41 : vector<8x128xf32>
    %44 = arith.divf %42, %43 : vector<8x128xf32>
    %45 = vector.extract_strided_slice %44 {offsets = [0, 0], sizes = [8, 32], strides = [1, 1]} : vector<8x128xf32> to vector<8x32xf32>
    %46 = vector.extract_strided_slice %44 {offsets = [0, 32], sizes = [8, 32], strides = [1, 1]} : vector<8x128xf32> to vector<8x32xf32>
    %47 = vector.extract_strided_slice %39 {offsets = [0, 64], sizes = [8, 32], strides = [1, 1]} : vector<8x128xf32> to vector<8x32xf32>
    %48 = math.tanh %47 : vector<8x32xf32>
    %49 = vector.extract_strided_slice %44 {offsets = [0, 96], sizes = [8, 32], strides = [1, 1]} : vector<8x128xf32> to vector<8x32xf32>
    %50 = arith.mulf %46, %9 : vector<8x32xf32>
    %51 = arith.mulf %45, %48 : vector<8x32xf32>
    %52 = arith.addf %50, %51 : vector<8x32xf32>
    %53 = math.tanh %52 : vector<8x32xf32>
    %54 = arith.mulf %49, %53 : vector<8x32xf32>
    %c1 = arith.constant 1 : index
    %c0_23 = arith.constant 0 : index
    %c0_24 = arith.constant 0 : index
    %55 = vector.load %arg1[%c1, %c0_23, %c0_24] : memref<8x8x4xbf16, #tpu.memory_space<vmem>>, vector<1x8x4xbf16>
    %56 = vector.shape_cast %55 : vector<1x8x4xbf16> to vector<8x4xbf16>
    %cst_25 = arith.constant dense<0.000000e+00> : vector<8x128xf32>
    %57 = tpu.matmul %56, %0, %cst_25 {dimension_numbers = #tpu.dot_dimension_numbers<[1], [0], [0], [1], [0, 0, 1, 1], [], []>} : vector<8x4xbf16>, vector<4x128xbf16>, vector<8x128xf32> -> vector<8x128xf32>
    %58 = arith.truncf %32 : vector<8x32xf32> to vector<8x32xbf16>
    %cst_26 = arith.constant dense<0.000000e+00> : vector<8x128xf32>
    %59 = tpu.matmul %58, %2, %cst_26 {dimension_numbers = #tpu.dot_dimension_numbers<[1], [0], [0], [1], [0, 0, 1, 1], [], []>} : vector<8x32xbf16>, vector<32x128xbf16>, vector<8x128xf32> -> vector<8x128xf32>
    %60 = arith.addf %57, %59 : vector<8x128xf32>
    %61 = vector.broadcast %4 : vector<1x128xf32> to vector<8x128xf32>
    %62 = arith.addf %60, %61 : vector<8x128xf32>
    %63 = arith.negf %62 : vector<8x128xf32>
    %64 = math.exp %63 : vector<8x128xf32>
    %cst_27 = arith.constant 1.000000e+00 : f32
    %65 = vector.broadcast %cst_27 : f32 to vector<8x128xf32>
    %66 = arith.addf %65, %64 : vector<8x128xf32>
    %67 = arith.divf %65, %66 : vector<8x128xf32>
    %68 = vector.extract_strided_slice %67 {offsets = [0, 0], sizes = [8, 32], strides = [1, 1]} : vector<8x128xf32> to vector<8x32xf32>
    %69 = vector.extract_strided_slice %67 {offsets = [0, 32], sizes = [8, 32], strides = [1, 1]} : vector<8x128xf32> to vector<8x32xf32>
    %70 = vector.extract_strided_slice %62 {offsets = [0, 64], sizes = [8, 32], strides = [1, 1]} : vector<8x128xf32> to vector<8x32xf32>
    %71 = math.tanh %70 : vector<8x32xf32>
    %72 = vector.extract_strided_slice %67 {offsets = [0, 96], sizes = [8, 32], strides = [1, 1]} : vector<8x128xf32> to vector<8x32xf32>
    %73 = arith.mulf %69, %30 : vector<8x32xf32>
    %74 = arith.mulf %68, %71 : vector<8x32xf32>
    %75 = arith.addf %73, %74 : vector<8x32xf32>
    %76 = math.tanh %75 : vector<8x32xf32>
    %77 = arith.mulf %72, %76 : vector<8x32xf32>
    %78 = arith.truncf %77 : vector<8x32xf32> to vector<8x32xbf16>
    %cst_28 = arith.constant dense<0.000000e+00> : vector<8x128xf32>
    %79 = tpu.matmul %78, %1, %cst_28 {dimension_numbers = #tpu.dot_dimension_numbers<[1], [0], [0], [1], [0, 0, 1, 1], [], []>} : vector<8x32xbf16>, vector<32x128xbf16>, vector<8x128xf32> -> vector<8x128xf32>
    %80 = arith.truncf %54 : vector<8x32xf32> to vector<8x32xbf16>
    %cst_29 = arith.constant dense<0.000000e+00> : vector<8x128xf32>
    %81 = tpu.matmul %80, %3, %cst_29 {dimension_numbers = #tpu.dot_dimension_numbers<[1], [0], [0], [1], [0, 0, 1, 1], [], []>} : vector<8x32xbf16>, vector<32x128xbf16>, vector<8x128xf32> -> vector<8x128xf32>
    %82 = arith.addf %79, %81 : vector<8x128xf32>
    %83 = vector.broadcast %5 : vector<1x128xf32> to vector<8x128xf32>
    %84 = arith.addf %82, %83 : vector<8x128xf32>
    %85 = arith.negf %84 : vector<8x128xf32>
    %86 = math.exp %85 : vector<8x128xf32>
    %cst_30 = arith.constant 1.000000e+00 : f32
    %87 = vector.broadcast %cst_30 : f32 to vector<8x128xf32>
    %88 = arith.addf %87, %86 : vector<8x128xf32>
    %89 = arith.divf %87, %88 : vector<8x128xf32>
    %90 = vector.extract_strided_slice %89 {offsets = [0, 0], sizes = [8, 32], strides = [1, 1]} : vector<8x128xf32> to vector<8x32xf32>
    %91 = vector.extract_strided_slice %89 {offsets = [0, 32], sizes = [8, 32], strides = [1, 1]} : vector<8x128xf32> to vector<8x32xf32>
    %92 = vector.extract_strided_slice %84 {offsets = [0, 64], sizes = [8, 32], strides = [1, 1]} : vector<8x128xf32> to vector<8x32xf32>
    %93 = math.tanh %92 : vector<8x32xf32>
    %94 = vector.extract_strided_slice %89 {offsets = [0, 96], sizes = [8, 32], strides = [1, 1]} : vector<8x128xf32> to vector<8x32xf32>
    %95 = arith.mulf %91, %52 : vector<8x32xf32>
    %96 = arith.mulf %90, %93 : vector<8x32xf32>
    %97 = arith.addf %95, %96 : vector<8x32xf32>
    %98 = math.tanh %97 : vector<8x32xf32>
    %99 = arith.mulf %94, %98 : vector<8x32xf32>
    %c2 = arith.constant 2 : index
    %c0_31 = arith.constant 0 : index
    %c0_32 = arith.constant 0 : index
    %100 = vector.load %arg1[%c2, %c0_31, %c0_32] : memref<8x8x4xbf16, #tpu.memory_space<vmem>>, vector<1x8x4xbf16>
    %101 = vector.shape_cast %100 : vector<1x8x4xbf16> to vector<8x4xbf16>
    %cst_33 = arith.constant dense<0.000000e+00> : vector<8x128xf32>
    %102 = tpu.matmul %101, %0, %cst_33 {dimension_numbers = #tpu.dot_dimension_numbers<[1], [0], [0], [1], [0, 0, 1, 1], [], []>} : vector<8x4xbf16>, vector<4x128xbf16>, vector<8x128xf32> -> vector<8x128xf32>
    %103 = arith.truncf %77 : vector<8x32xf32> to vector<8x32xbf16>
    %cst_34 = arith.constant dense<0.000000e+00> : vector<8x128xf32>
    %104 = tpu.matmul %103, %2, %cst_34 {dimension_numbers = #tpu.dot_dimension_numbers<[1], [0], [0], [1], [0, 0, 1, 1], [], []>} : vector<8x32xbf16>, vector<32x128xbf16>, vector<8x128xf32> -> vector<8x128xf32>
    %105 = arith.addf %102, %104 : vector<8x128xf32>
    %106 = vector.broadcast %4 : vector<1x128xf32> to vector<8x128xf32>
    %107 = arith.addf %105, %106 : vector<8x128xf32>
    %108 = arith.negf %107 : vector<8x128xf32>
    %109 = math.exp %108 : vector<8x128xf32>
    %cst_35 = arith.constant 1.000000e+00 : f32
    %110 = vector.broadcast %cst_35 : f32 to vector<8x128xf32>
    %111 = arith.addf %110, %109 : vector<8x128xf32>
    %112 = arith.divf %110, %111 : vector<8x128xf32>
    %113 = vector.extract_strided_slice %112 {offsets = [0, 0], sizes = [8, 32], strides = [1, 1]} : vector<8x128xf32> to vector<8x32xf32>
    %114 = vector.extract_strided_slice %112 {offsets = [0, 32], sizes = [8, 32], strides = [1, 1]} : vector<8x128xf32> to vector<8x32xf32>
    %115 = vector.extract_strided_slice %107 {offsets = [0, 64], sizes = [8, 32], strides = [1, 1]} : vector<8x128xf32> to vector<8x32xf32>
    %116 = math.tanh %115 : vector<8x32xf32>
    %117 = vector.extract_strided_slice %112 {offsets = [0, 96], sizes = [8, 32], strides = [1, 1]} : vector<8x128xf32> to vector<8x32xf32>
    %118 = arith.mulf %114, %75 : vector<8x32xf32>
    %119 = arith.mulf %113, %116 : vector<8x32xf32>
    %120 = arith.addf %118, %119 : vector<8x32xf32>
    %121 = math.tanh %120 : vector<8x32xf32>
    %122 = arith.mulf %117, %121 : vector<8x32xf32>
    %123 = arith.truncf %122 : vector<8x32xf32> to vector<8x32xbf16>
    %cst_36 = arith.constant dense<0.000000e+00> : vector<8x128xf32>
    %124 = tpu.matmul %123, %1, %cst_36 {dimension_numbers = #tpu.dot_dimension_numbers<[1], [0], [0], [1], [0, 0, 1, 1], [], []>} : vector<8x32xbf16>, vector<32x128xbf16>, vector<8x128xf32> -> vector<8x128xf32>
    %125 = arith.truncf %99 : vector<8x32xf32> to vector<8x32xbf16>
    %cst_37 = arith.constant dense<0.000000e+00> : vector<8x128xf32>
    %126 = tpu.matmul %125, %3, %cst_37 {dimension_numbers = #tpu.dot_dimension_numbers<[1], [0], [0], [1], [0, 0, 1, 1], [], []>} : vector<8x32xbf16>, vector<32x128xbf16>, vector<8x128xf32> -> vector<8x128xf32>
    %127 = arith.addf %124, %126 : vector<8x128xf32>
    %128 = vector.broadcast %5 : vector<1x128xf32> to vector<8x128xf32>
    %129 = arith.addf %127, %128 : vector<8x128xf32>
    %130 = arith.negf %129 : vector<8x128xf32>
    %131 = math.exp %130 : vector<8x128xf32>
    %cst_38 = arith.constant 1.000000e+00 : f32
    %132 = vector.broadcast %cst_38 : f32 to vector<8x128xf32>
    %133 = arith.addf %132, %131 : vector<8x128xf32>
    %134 = arith.divf %132, %133 : vector<8x128xf32>
    %135 = vector.extract_strided_slice %134 {offsets = [0, 0], sizes = [8, 32], strides = [1, 1]} : vector<8x128xf32> to vector<8x32xf32>
    %136 = vector.extract_strided_slice %134 {offsets = [0, 32], sizes = [8, 32], strides = [1, 1]} : vector<8x128xf32> to vector<8x32xf32>
    %137 = vector.extract_strided_slice %129 {offsets = [0, 64], sizes = [8, 32], strides = [1, 1]} : vector<8x128xf32> to vector<8x32xf32>
    %138 = math.tanh %137 : vector<8x32xf32>
    %139 = vector.extract_strided_slice %134 {offsets = [0, 96], sizes = [8, 32], strides = [1, 1]} : vector<8x128xf32> to vector<8x32xf32>
    %140 = arith.mulf %136, %97 : vector<8x32xf32>
    %141 = arith.mulf %135, %138 : vector<8x32xf32>
    %142 = arith.addf %140, %141 : vector<8x32xf32>
    %143 = math.tanh %142 : vector<8x32xf32>
    %144 = arith.mulf %139, %143 : vector<8x32xf32>
    %c3 = arith.constant 3 : index
    %c0_39 = arith.constant 0 : index
    %c0_40 = arith.constant 0 : index
    %145 = vector.load %arg1[%c3, %c0_39, %c0_40] : memref<8x8x4xbf16, #tpu.memory_space<vmem>>, vector<1x8x4xbf16>
    %146 = vector.shape_cast %145 : vector<1x8x4xbf16> to vector<8x4xbf16>
    %cst_41 = arith.constant dense<0.000000e+00> : vector<8x128xf32>
    %147 = tpu.matmul %146, %0, %cst_41 {dimension_numbers = #tpu.dot_dimension_numbers<[1], [0], [0], [1], [0, 0, 1, 1], [], []>} : vector<8x4xbf16>, vector<4x128xbf16>, vector<8x128xf32> -> vector<8x128xf32>
    %148 = arith.truncf %122 : vector<8x32xf32> to vector<8x32xbf16>
    %cst_42 = arith.constant dense<0.000000e+00> : vector<8x128xf32>
    %149 = tpu.matmul %148, %2, %cst_42 {dimension_numbers = #tpu.dot_dimension_numbers<[1], [0], [0], [1], [0, 0, 1, 1], [], []>} : vector<8x32xbf16>, vector<32x128xbf16>, vector<8x128xf32> -> vector<8x128xf32>
    %150 = arith.addf %147, %149 : vector<8x128xf32>
    %151 = vector.broadcast %4 : vector<1x128xf32> to vector<8x128xf32>
    %152 = arith.addf %150, %151 : vector<8x128xf32>
    %153 = arith.negf %152 : vector<8x128xf32>
    %154 = math.exp %153 : vector<8x128xf32>
    %cst_43 = arith.constant 1.000000e+00 : f32
    %155 = vector.broadcast %cst_43 : f32 to vector<8x128xf32>
    %156 = arith.addf %155, %154 : vector<8x128xf32>
    %157 = arith.divf %155, %156 : vector<8x128xf32>
    %158 = vector.extract_strided_slice %157 {offsets = [0, 0], sizes = [8, 32], strides = [1, 1]} : vector<8x128xf32> to vector<8x32xf32>
    %159 = vector.extract_strided_slice %157 {offsets = [0, 32], sizes = [8, 32], strides = [1, 1]} : vector<8x128xf32> to vector<8x32xf32>
    %160 = vector.extract_strided_slice %152 {offsets = [0, 64], sizes = [8, 32], strides = [1, 1]} : vector<8x128xf32> to vector<8x32xf32>
    %161 = math.tanh %160 : vector<8x32xf32>
    %162 = vector.extract_strided_slice %157 {offsets = [0, 96], sizes = [8, 32], strides = [1, 1]} : vector<8x128xf32> to vector<8x32xf32>
    %163 = arith.mulf %159, %120 : vector<8x32xf32>
    %164 = arith.mulf %158, %161 : vector<8x32xf32>
    %165 = arith.addf %163, %164 : vector<8x32xf32>
    %166 = math.tanh %165 : vector<8x32xf32>
    %167 = arith.mulf %162, %166 : vector<8x32xf32>
    %168 = arith.truncf %167 : vector<8x32xf32> to vector<8x32xbf16>
    %cst_44 = arith.constant dense<0.000000e+00> : vector<8x128xf32>
    %169 = tpu.matmul %168, %1, %cst_44 {dimension_numbers = #tpu.dot_dimension_numbers<[1], [0], [0], [1], [0, 0, 1, 1], [], []>} : vector<8x32xbf16>, vector<32x128xbf16>, vector<8x128xf32> -> vector<8x128xf32>
    %170 = arith.truncf %144 : vector<8x32xf32> to vector<8x32xbf16>
    %cst_45 = arith.constant dense<0.000000e+00> : vector<8x128xf32>
    %171 = tpu.matmul %170, %3, %cst_45 {dimension_numbers = #tpu.dot_dimension_numbers<[1], [0], [0], [1], [0, 0, 1, 1], [], []>} : vector<8x32xbf16>, vector<32x128xbf16>, vector<8x128xf32> -> vector<8x128xf32>
    %172 = arith.addf %169, %171 : vector<8x128xf32>
    %173 = vector.broadcast %5 : vector<1x128xf32> to vector<8x128xf32>
    %174 = arith.addf %172, %173 : vector<8x128xf32>
    %175 = arith.negf %174 : vector<8x128xf32>
    %176 = math.exp %175 : vector<8x128xf32>
    %cst_46 = arith.constant 1.000000e+00 : f32
    %177 = vector.broadcast %cst_46 : f32 to vector<8x128xf32>
    %178 = arith.addf %177, %176 : vector<8x128xf32>
    %179 = arith.divf %177, %178 : vector<8x128xf32>
    %180 = vector.extract_strided_slice %179 {offsets = [0, 0], sizes = [8, 32], strides = [1, 1]} : vector<8x128xf32> to vector<8x32xf32>
    %181 = vector.extract_strided_slice %179 {offsets = [0, 32], sizes = [8, 32], strides = [1, 1]} : vector<8x128xf32> to vector<8x32xf32>
    %182 = vector.extract_strided_slice %174 {offsets = [0, 64], sizes = [8, 32], strides = [1, 1]} : vector<8x128xf32> to vector<8x32xf32>
    %183 = math.tanh %182 : vector<8x32xf32>
    %184 = vector.extract_strided_slice %179 {offsets = [0, 96], sizes = [8, 32], strides = [1, 1]} : vector<8x128xf32> to vector<8x32xf32>
    %185 = arith.mulf %181, %142 : vector<8x32xf32>
    %186 = arith.mulf %180, %183 : vector<8x32xf32>
    %187 = arith.addf %185, %186 : vector<8x32xf32>
    %188 = math.tanh %187 : vector<8x32xf32>
    %189 = arith.mulf %184, %188 : vector<8x32xf32>
    %c4 = arith.constant 4 : index
    %c0_47 = arith.constant 0 : index
    %c0_48 = arith.constant 0 : index
    %190 = vector.load %arg1[%c4, %c0_47, %c0_48] : memref<8x8x4xbf16, #tpu.memory_space<vmem>>, vector<1x8x4xbf16>
    %191 = vector.shape_cast %190 : vector<1x8x4xbf16> to vector<8x4xbf16>
    %cst_49 = arith.constant dense<0.000000e+00> : vector<8x128xf32>
    %192 = tpu.matmul %191, %0, %cst_49 {dimension_numbers = #tpu.dot_dimension_numbers<[1], [0], [0], [1], [0, 0, 1, 1], [], []>} : vector<8x4xbf16>, vector<4x128xbf16>, vector<8x128xf32> -> vector<8x128xf32>
    %193 = arith.truncf %167 : vector<8x32xf32> to vector<8x32xbf16>
    %cst_50 = arith.constant dense<0.000000e+00> : vector<8x128xf32>
    %194 = tpu.matmul %193, %2, %cst_50 {dimension_numbers = #tpu.dot_dimension_numbers<[1], [0], [0], [1], [0, 0, 1, 1], [], []>} : vector<8x32xbf16>, vector<32x128xbf16>, vector<8x128xf32> -> vector<8x128xf32>
    %195 = arith.addf %192, %194 : vector<8x128xf32>
    %196 = vector.broadcast %4 : vector<1x128xf32> to vector<8x128xf32>
    %197 = arith.addf %195, %196 : vector<8x128xf32>
    %198 = arith.negf %197 : vector<8x128xf32>
    %199 = math.exp %198 : vector<8x128xf32>
    %cst_51 = arith.constant 1.000000e+00 : f32
    %200 = vector.broadcast %cst_51 : f32 to vector<8x128xf32>
    %201 = arith.addf %200, %199 : vector<8x128xf32>
    %202 = arith.divf %200, %201 : vector<8x128xf32>
    %203 = vector.extract_strided_slice %202 {offsets = [0, 0], sizes = [8, 32], strides = [1, 1]} : vector<8x128xf32> to vector<8x32xf32>
    %204 = vector.extract_strided_slice %202 {offsets = [0, 32], sizes = [8, 32], strides = [1, 1]} : vector<8x128xf32> to vector<8x32xf32>
    %205 = vector.extract_strided_slice %197 {offsets = [0, 64], sizes = [8, 32], strides = [1, 1]} : vector<8x128xf32> to vector<8x32xf32>
    %206 = math.tanh %205 : vector<8x32xf32>
    %207 = vector.extract_strided_slice %202 {offsets = [0, 96], sizes = [8, 32], strides = [1, 1]} : vector<8x128xf32> to vector<8x32xf32>
    %208 = arith.mulf %204, %165 : vector<8x32xf32>
    %209 = arith.mulf %203, %206 : vector<8x32xf32>
    %210 = arith.addf %208, %209 : vector<8x32xf32>
    %211 = math.tanh %210 : vector<8x32xf32>
    %212 = arith.mulf %207, %211 : vector<8x32xf32>
    %213 = arith.truncf %212 : vector<8x32xf32> to vector<8x32xbf16>
    %cst_52 = arith.constant dense<0.000000e+00> : vector<8x128xf32>
    %214 = tpu.matmul %213, %1, %cst_52 {dimension_numbers = #tpu.dot_dimension_numbers<[1], [0], [0], [1], [0, 0, 1, 1], [], []>} : vector<8x32xbf16>, vector<32x128xbf16>, vector<8x128xf32> -> vector<8x128xf32>
    %215 = arith.truncf %189 : vector<8x32xf32> to vector<8x32xbf16>
    %cst_53 = arith.constant dense<0.000000e+00> : vector<8x128xf32>
    %216 = tpu.matmul %215, %3, %cst_53 {dimension_numbers = #tpu.dot_dimension_numbers<[1], [0], [0], [1], [0, 0, 1, 1], [], []>} : vector<8x32xbf16>, vector<32x128xbf16>, vector<8x128xf32> -> vector<8x128xf32>
    %217 = arith.addf %214, %216 : vector<8x128xf32>
    %218 = vector.broadcast %5 : vector<1x128xf32> to vector<8x128xf32>
    %219 = arith.addf %217, %218 : vector<8x128xf32>
    %220 = arith.negf %219 : vector<8x128xf32>
    %221 = math.exp %220 : vector<8x128xf32>
    %cst_54 = arith.constant 1.000000e+00 : f32
    %222 = vector.broadcast %cst_54 : f32 to vector<8x128xf32>
    %223 = arith.addf %222, %221 : vector<8x128xf32>
    %224 = arith.divf %222, %223 : vector<8x128xf32>
    %225 = vector.extract_strided_slice %224 {offsets = [0, 0], sizes = [8, 32], strides = [1, 1]} : vector<8x128xf32> to vector<8x32xf32>
    %226 = vector.extract_strided_slice %224 {offsets = [0, 32], sizes = [8, 32], strides = [1, 1]} : vector<8x128xf32> to vector<8x32xf32>
    %227 = vector.extract_strided_slice %219 {offsets = [0, 64], sizes = [8, 32], strides = [1, 1]} : vector<8x128xf32> to vector<8x32xf32>
    %228 = math.tanh %227 : vector<8x32xf32>
    %229 = vector.extract_strided_slice %224 {offsets = [0, 96], sizes = [8, 32], strides = [1, 1]} : vector<8x128xf32> to vector<8x32xf32>
    %230 = arith.mulf %226, %187 : vector<8x32xf32>
    %231 = arith.mulf %225, %228 : vector<8x32xf32>
    %232 = arith.addf %230, %231 : vector<8x32xf32>
    %233 = math.tanh %232 : vector<8x32xf32>
    %234 = arith.mulf %229, %233 : vector<8x32xf32>
    %c5 = arith.constant 5 : index
    %c0_55 = arith.constant 0 : index
    %c0_56 = arith.constant 0 : index
    %235 = vector.load %arg1[%c5, %c0_55, %c0_56] : memref<8x8x4xbf16, #tpu.memory_space<vmem>>, vector<1x8x4xbf16>
    %236 = vector.shape_cast %235 : vector<1x8x4xbf16> to vector<8x4xbf16>
    %cst_57 = arith.constant dense<0.000000e+00> : vector<8x128xf32>
    %237 = tpu.matmul %236, %0, %cst_57 {dimension_numbers = #tpu.dot_dimension_numbers<[1], [0], [0], [1], [0, 0, 1, 1], [], []>} : vector<8x4xbf16>, vector<4x128xbf16>, vector<8x128xf32> -> vector<8x128xf32>
    %238 = arith.truncf %212 : vector<8x32xf32> to vector<8x32xbf16>
    %cst_58 = arith.constant dense<0.000000e+00> : vector<8x128xf32>
    %239 = tpu.matmul %238, %2, %cst_58 {dimension_numbers = #tpu.dot_dimension_numbers<[1], [0], [0], [1], [0, 0, 1, 1], [], []>} : vector<8x32xbf16>, vector<32x128xbf16>, vector<8x128xf32> -> vector<8x128xf32>
    %240 = arith.addf %237, %239 : vector<8x128xf32>
    %241 = vector.broadcast %4 : vector<1x128xf32> to vector<8x128xf32>
    %242 = arith.addf %240, %241 : vector<8x128xf32>
    %243 = arith.negf %242 : vector<8x128xf32>
    %244 = math.exp %243 : vector<8x128xf32>
    %cst_59 = arith.constant 1.000000e+00 : f32
    %245 = vector.broadcast %cst_59 : f32 to vector<8x128xf32>
    %246 = arith.addf %245, %244 : vector<8x128xf32>
    %247 = arith.divf %245, %246 : vector<8x128xf32>
    %248 = vector.extract_strided_slice %247 {offsets = [0, 0], sizes = [8, 32], strides = [1, 1]} : vector<8x128xf32> to vector<8x32xf32>
    %249 = vector.extract_strided_slice %247 {offsets = [0, 32], sizes = [8, 32], strides = [1, 1]} : vector<8x128xf32> to vector<8x32xf32>
    %250 = vector.extract_strided_slice %242 {offsets = [0, 64], sizes = [8, 32], strides = [1, 1]} : vector<8x128xf32> to vector<8x32xf32>
    %251 = math.tanh %250 : vector<8x32xf32>
    %252 = vector.extract_strided_slice %247 {offsets = [0, 96], sizes = [8, 32], strides = [1, 1]} : vector<8x128xf32> to vector<8x32xf32>
    %253 = arith.mulf %249, %210 : vector<8x32xf32>
    %254 = arith.mulf %248, %251 : vector<8x32xf32>
    %255 = arith.addf %253, %254 : vector<8x32xf32>
    %256 = math.tanh %255 : vector<8x32xf32>
    %257 = arith.mulf %252, %256 : vector<8x32xf32>
    %258 = arith.truncf %257 : vector<8x32xf32> to vector<8x32xbf16>
    %cst_60 = arith.constant dense<0.000000e+00> : vector<8x128xf32>
    %259 = tpu.matmul %258, %1, %cst_60 {dimension_numbers = #tpu.dot_dimension_numbers<[1], [0], [0], [1], [0, 0, 1, 1], [], []>} : vector<8x32xbf16>, vector<32x128xbf16>, vector<8x128xf32> -> vector<8x128xf32>
    %260 = arith.truncf %234 : vector<8x32xf32> to vector<8x32xbf16>
    %cst_61 = arith.constant dense<0.000000e+00> : vector<8x128xf32>
    %261 = tpu.matmul %260, %3, %cst_61 {dimension_numbers = #tpu.dot_dimension_numbers<[1], [0], [0], [1], [0, 0, 1, 1], [], []>} : vector<8x32xbf16>, vector<32x128xbf16>, vector<8x128xf32> -> vector<8x128xf32>
    %262 = arith.addf %259, %261 : vector<8x128xf32>
    %263 = vector.broadcast %5 : vector<1x128xf32> to vector<8x128xf32>
    %264 = arith.addf %262, %263 : vector<8x128xf32>
    %265 = arith.negf %264 : vector<8x128xf32>
    %266 = math.exp %265 : vector<8x128xf32>
    %cst_62 = arith.constant 1.000000e+00 : f32
    %267 = vector.broadcast %cst_62 : f32 to vector<8x128xf32>
    %268 = arith.addf %267, %266 : vector<8x128xf32>
    %269 = arith.divf %267, %268 : vector<8x128xf32>
    %270 = vector.extract_strided_slice %269 {offsets = [0, 0], sizes = [8, 32], strides = [1, 1]} : vector<8x128xf32> to vector<8x32xf32>
    %271 = vector.extract_strided_slice %269 {offsets = [0, 32], sizes = [8, 32], strides = [1, 1]} : vector<8x128xf32> to vector<8x32xf32>
    %272 = vector.extract_strided_slice %264 {offsets = [0, 64], sizes = [8, 32], strides = [1, 1]} : vector<8x128xf32> to vector<8x32xf32>
    %273 = math.tanh %272 : vector<8x32xf32>
    %274 = vector.extract_strided_slice %269 {offsets = [0, 96], sizes = [8, 32], strides = [1, 1]} : vector<8x128xf32> to vector<8x32xf32>
    %275 = arith.mulf %271, %232 : vector<8x32xf32>
    %276 = arith.mulf %270, %273 : vector<8x32xf32>
    %277 = arith.addf %275, %276 : vector<8x32xf32>
    %278 = math.tanh %277 : vector<8x32xf32>
    %279 = arith.mulf %274, %278 : vector<8x32xf32>
    %c6 = arith.constant 6 : index
    %c0_63 = arith.constant 0 : index
    %c0_64 = arith.constant 0 : index
    %280 = vector.load %arg1[%c6, %c0_63, %c0_64] : memref<8x8x4xbf16, #tpu.memory_space<vmem>>, vector<1x8x4xbf16>
    %281 = vector.shape_cast %280 : vector<1x8x4xbf16> to vector<8x4xbf16>
    %cst_65 = arith.constant dense<0.000000e+00> : vector<8x128xf32>
    %282 = tpu.matmul %281, %0, %cst_65 {dimension_numbers = #tpu.dot_dimension_numbers<[1], [0], [0], [1], [0, 0, 1, 1], [], []>} : vector<8x4xbf16>, vector<4x128xbf16>, vector<8x128xf32> -> vector<8x128xf32>
    %283 = arith.truncf %257 : vector<8x32xf32> to vector<8x32xbf16>
    %cst_66 = arith.constant dense<0.000000e+00> : vector<8x128xf32>
    %284 = tpu.matmul %283, %2, %cst_66 {dimension_numbers = #tpu.dot_dimension_numbers<[1], [0], [0], [1], [0, 0, 1, 1], [], []>} : vector<8x32xbf16>, vector<32x128xbf16>, vector<8x128xf32> -> vector<8x128xf32>
    %285 = arith.addf %282, %284 : vector<8x128xf32>
    %286 = vector.broadcast %4 : vector<1x128xf32> to vector<8x128xf32>
    %287 = arith.addf %285, %286 : vector<8x128xf32>
    %288 = arith.negf %287 : vector<8x128xf32>
    %289 = math.exp %288 : vector<8x128xf32>
    %cst_67 = arith.constant 1.000000e+00 : f32
    %290 = vector.broadcast %cst_67 : f32 to vector<8x128xf32>
    %291 = arith.addf %290, %289 : vector<8x128xf32>
    %292 = arith.divf %290, %291 : vector<8x128xf32>
    %293 = vector.extract_strided_slice %292 {offsets = [0, 0], sizes = [8, 32], strides = [1, 1]} : vector<8x128xf32> to vector<8x32xf32>
    %294 = vector.extract_strided_slice %292 {offsets = [0, 32], sizes = [8, 32], strides = [1, 1]} : vector<8x128xf32> to vector<8x32xf32>
    %295 = vector.extract_strided_slice %287 {offsets = [0, 64], sizes = [8, 32], strides = [1, 1]} : vector<8x128xf32> to vector<8x32xf32>
    %296 = math.tanh %295 : vector<8x32xf32>
    %297 = vector.extract_strided_slice %292 {offsets = [0, 96], sizes = [8, 32], strides = [1, 1]} : vector<8x128xf32> to vector<8x32xf32>
    %298 = arith.mulf %294, %255 : vector<8x32xf32>
    %299 = arith.mulf %293, %296 : vector<8x32xf32>
    %300 = arith.addf %298, %299 : vector<8x32xf32>
    %301 = math.tanh %300 : vector<8x32xf32>
    %302 = arith.mulf %297, %301 : vector<8x32xf32>
    %303 = arith.truncf %302 : vector<8x32xf32> to vector<8x32xbf16>
    %cst_68 = arith.constant dense<0.000000e+00> : vector<8x128xf32>
    %304 = tpu.matmul %303, %1, %cst_68 {dimension_numbers = #tpu.dot_dimension_numbers<[1], [0], [0], [1], [0, 0, 1, 1], [], []>} : vector<8x32xbf16>, vector<32x128xbf16>, vector<8x128xf32> -> vector<8x128xf32>
    %305 = arith.truncf %279 : vector<8x32xf32> to vector<8x32xbf16>
    %cst_69 = arith.constant dense<0.000000e+00> : vector<8x128xf32>
    %306 = tpu.matmul %305, %3, %cst_69 {dimension_numbers = #tpu.dot_dimension_numbers<[1], [0], [0], [1], [0, 0, 1, 1], [], []>} : vector<8x32xbf16>, vector<32x128xbf16>, vector<8x128xf32> -> vector<8x128xf32>
    %307 = arith.addf %304, %306 : vector<8x128xf32>
    %308 = vector.broadcast %5 : vector<1x128xf32> to vector<8x128xf32>
    %309 = arith.addf %307, %308 : vector<8x128xf32>
    %310 = arith.negf %309 : vector<8x128xf32>
    %311 = math.exp %310 : vector<8x128xf32>
    %cst_70 = arith.constant 1.000000e+00 : f32
    %312 = vector.broadcast %cst_70 : f32 to vector<8x128xf32>
    %313 = arith.addf %312, %311 : vector<8x128xf32>
    %314 = arith.divf %312, %313 : vector<8x128xf32>
    %315 = vector.extract_strided_slice %314 {offsets = [0, 0], sizes = [8, 32], strides = [1, 1]} : vector<8x128xf32> to vector<8x32xf32>
    %316 = vector.extract_strided_slice %314 {offsets = [0, 32], sizes = [8, 32], strides = [1, 1]} : vector<8x128xf32> to vector<8x32xf32>
    %317 = vector.extract_strided_slice %309 {offsets = [0, 64], sizes = [8, 32], strides = [1, 1]} : vector<8x128xf32> to vector<8x32xf32>
    %318 = math.tanh %317 : vector<8x32xf32>
    %319 = vector.extract_strided_slice %314 {offsets = [0, 96], sizes = [8, 32], strides = [1, 1]} : vector<8x128xf32> to vector<8x32xf32>
    %320 = arith.mulf %316, %277 : vector<8x32xf32>
    %321 = arith.mulf %315, %318 : vector<8x32xf32>
    %322 = arith.addf %320, %321 : vector<8x32xf32>
    %323 = math.tanh %322 : vector<8x32xf32>
    %324 = arith.mulf %319, %323 : vector<8x32xf32>
    %c7 = arith.constant 7 : index
    %c0_71 = arith.constant 0 : index
    %c0_72 = arith.constant 0 : index
    %325 = vector.load %arg1[%c7, %c0_71, %c0_72] : memref<8x8x4xbf16, #tpu.memory_space<vmem>>, vector<1x8x4xbf16>
    %326 = vector.shape_cast %325 : vector<1x8x4xbf16> to vector<8x4xbf16>
    %cst_73 = arith.constant dense<0.000000e+00> : vector<8x128xf32>
    %327 = tpu.matmul %326, %0, %cst_73 {dimension_numbers = #tpu.dot_dimension_numbers<[1], [0], [0], [1], [0, 0, 1, 1], [], []>} : vector<8x4xbf16>, vector<4x128xbf16>, vector<8x128xf32> -> vector<8x128xf32>
    %328 = arith.truncf %302 : vector<8x32xf32> to vector<8x32xbf16>
    %cst_74 = arith.constant dense<0.000000e+00> : vector<8x128xf32>
    %329 = tpu.matmul %328, %2, %cst_74 {dimension_numbers = #tpu.dot_dimension_numbers<[1], [0], [0], [1], [0, 0, 1, 1], [], []>} : vector<8x32xbf16>, vector<32x128xbf16>, vector<8x128xf32> -> vector<8x128xf32>
    %330 = arith.addf %327, %329 : vector<8x128xf32>
    %331 = vector.broadcast %4 : vector<1x128xf32> to vector<8x128xf32>
    %332 = arith.addf %330, %331 : vector<8x128xf32>
    %333 = arith.negf %332 : vector<8x128xf32>
    %334 = math.exp %333 : vector<8x128xf32>
    %cst_75 = arith.constant 1.000000e+00 : f32
    %335 = vector.broadcast %cst_75 : f32 to vector<8x128xf32>
    %336 = arith.addf %335, %334 : vector<8x128xf32>
    %337 = arith.divf %335, %336 : vector<8x128xf32>
    %338 = vector.extract_strided_slice %337 {offsets = [0, 0], sizes = [8, 32], strides = [1, 1]} : vector<8x128xf32> to vector<8x32xf32>
    %339 = vector.extract_strided_slice %337 {offsets = [0, 32], sizes = [8, 32], strides = [1, 1]} : vector<8x128xf32> to vector<8x32xf32>
    %340 = vector.extract_strided_slice %332 {offsets = [0, 64], sizes = [8, 32], strides = [1, 1]} : vector<8x128xf32> to vector<8x32xf32>
    %341 = math.tanh %340 : vector<8x32xf32>
    %342 = vector.extract_strided_slice %337 {offsets = [0, 96], sizes = [8, 32], strides = [1, 1]} : vector<8x128xf32> to vector<8x32xf32>
    %343 = arith.mulf %339, %300 : vector<8x32xf32>
    %344 = arith.mulf %338, %341 : vector<8x32xf32>
    %345 = arith.addf %343, %344 : vector<8x32xf32>
    %346 = math.tanh %345 : vector<8x32xf32>
    %347 = arith.mulf %342, %346 : vector<8x32xf32>
    %348 = arith.truncf %347 : vector<8x32xf32> to vector<8x32xbf16>
    %cst_76 = arith.constant dense<0.000000e+00> : vector<8x128xf32>
    %349 = tpu.matmul %348, %1, %cst_76 {dimension_numbers = #tpu.dot_dimension_numbers<[1], [0], [0], [1], [0, 0, 1, 1], [], []>} : vector<8x32xbf16>, vector<32x128xbf16>, vector<8x128xf32> -> vector<8x128xf32>
    %350 = arith.truncf %324 : vector<8x32xf32> to vector<8x32xbf16>
    %cst_77 = arith.constant dense<0.000000e+00> : vector<8x128xf32>
    %351 = tpu.matmul %350, %3, %cst_77 {dimension_numbers = #tpu.dot_dimension_numbers<[1], [0], [0], [1], [0, 0, 1, 1], [], []>} : vector<8x32xbf16>, vector<32x128xbf16>, vector<8x128xf32> -> vector<8x128xf32>
    %352 = arith.addf %349, %351 : vector<8x128xf32>
    %353 = vector.broadcast %5 : vector<1x128xf32> to vector<8x128xf32>
    %354 = arith.addf %352, %353 : vector<8x128xf32>
    %355 = arith.negf %354 : vector<8x128xf32>
    %356 = math.exp %355 : vector<8x128xf32>
    %cst_78 = arith.constant 1.000000e+00 : f32
    %357 = vector.broadcast %cst_78 : f32 to vector<8x128xf32>
    %358 = arith.addf %357, %356 : vector<8x128xf32>
    %359 = arith.divf %357, %358 : vector<8x128xf32>
    %360 = vector.extract_strided_slice %359 {offsets = [0, 0], sizes = [8, 32], strides = [1, 1]} : vector<8x128xf32> to vector<8x32xf32>
    %361 = vector.extract_strided_slice %359 {offsets = [0, 32], sizes = [8, 32], strides = [1, 1]} : vector<8x128xf32> to vector<8x32xf32>
    %362 = vector.extract_strided_slice %354 {offsets = [0, 64], sizes = [8, 32], strides = [1, 1]} : vector<8x128xf32> to vector<8x32xf32>
    %363 = math.tanh %362 : vector<8x32xf32>
    %364 = vector.extract_strided_slice %359 {offsets = [0, 96], sizes = [8, 32], strides = [1, 1]} : vector<8x128xf32> to vector<8x32xf32>
    %365 = arith.mulf %361, %322 : vector<8x32xf32>
    %366 = arith.mulf %360, %363 : vector<8x32xf32>
    %367 = arith.addf %365, %366 : vector<8x32xf32>
    %368 = math.tanh %367 : vector<8x32xf32>
    %369 = arith.mulf %364, %368 : vector<8x32xf32>
    %c0_79 = arith.constant 0 : index
    %c0_80 = arith.constant 0 : index
    %370 = vector.load %arg8[%c0_79, %c0_80] : memref<1x32xf32, #tpu.memory_space<vmem>>, vector<1x32xf32>
    %c0_81 = arith.constant 0 : index
    %c0_82 = arith.constant 0 : index
    %371 = vector.load %arg9[%c0_81, %c0_82] : memref<1x1xf32, #tpu.memory_space<vmem>>, vector<1x1xf32>
    %372 = vector.broadcast %370 : vector<1x32xf32> to vector<8x32xf32>
    %373 = arith.mulf %369, %372 : vector<8x32xf32>
    %cst_83 = arith.constant dense<0.000000e+00> : vector<8xf32>
    %374 = vector.multi_reduction <add>, %373, %cst_83 [1] : vector<8x32xf32> to vector<8xf32>
    %375 = vector.shape_cast %374 : vector<8xf32> to vector<8x1xf32>
    %376 = vector.broadcast %371 : vector<1x1xf32> to vector<8x1xf32>
    %377 = arith.addf %375, %376 : vector<8x1xf32>
    %c0_84 = arith.constant 0 : index
    %c0_85 = arith.constant 0 : index
    %378 = vector.load %arg10[%c0_84, %c0_85] : memref<8x1xf32, #tpu.memory_space<vmem>>, vector<8x1xf32>
    tpu.vector_store %arg10[%c0_84, %c0_85], %377 {strides = array<i32>} : memref<8x1xf32, #tpu.memory_space<vmem>>, vector<8x1xf32>,
    return
  }
  func.func @transform_0(%arg0: i32) -> (i32, i32, i32) {
    %c0_i32 = arith.constant 0 : i32
    %c0_i32_0 = arith.constant 0 : i32
    %c0_i32_1 = arith.constant 0 : i32
    return %c0_i32, %arg0, %c0_i32_0 : i32, i32, i32
  }
  func.func @transform_1(%arg0: i32) -> (i32, i32) {
    %c0_i32 = arith.constant 0 : i32
    %c0_i32_0 = arith.constant 0 : i32
    %c0_i32_1 = arith.constant 0 : i32
    return %c0_i32, %c0_i32_0 : i32, i32
  }
  func.func @transform_2(%arg0: i32) -> (i32, i32) {
    %c0_i32 = arith.constant 0 : i32
    %c0_i32_0 = arith.constant 0 : i32
    %c0_i32_1 = arith.constant 0 : i32
    return %c0_i32, %c0_i32_0 : i32, i32
  }
  func.func @transform_3(%arg0: i32) -> (i32, i32) {
    %c0_i32 = arith.constant 0 : i32
    %c0_i32_0 = arith.constant 0 : i32
    %c0_i32_1 = arith.constant 0 : i32
    return %c0_i32, %c0_i32_0 : i32, i32
  }
  func.func @transform_4(%arg0: i32) -> (i32, i32) {
    %c0_i32 = arith.constant 0 : i32
    %c0_i32_0 = arith.constant 0 : i32
    %c0_i32_1 = arith.constant 0 : i32
    return %c0_i32, %c0_i32_0 : i32, i32
  }
  func.func @transform_5(%arg0: i32) -> (i32, i32) {
    %c0_i32 = arith.constant 0 : i32
    %c0_i32_0 = arith.constant 0 : i32
    %c0_i32_1 = arith.constant 0 : i32
    return %c0_i32, %c0_i32_0 : i32, i32
  }
  func.func @transform_6(%arg0: i32) -> (i32, i32) {
    %c0_i32 = arith.constant 0 : i32
    %c0_i32_0 = arith.constant 0 : i32
    %c0_i32_1 = arith.constant 0 : i32
    return %c0_i32, %c0_i32_0 : i32, i32
  }
  func.func @transform_7(%arg0: i32) -> (i32, i32) {
    %c0_i32 = arith.constant 0 : i32
    %c0_i32_0 = arith.constant 0 : i32
    %c0_i32_1 = arith.constant 0 : i32
    return %c0_i32, %c0_i32_0 : i32, i32
  }
  func.func @transform_8(%arg0: i32) -> (i32, i32) {
    %c0_i32 = arith.constant 0 : i32
    %c0_i32_0 = arith.constant 0 : i32
    %c0_i32_1 = arith.constant 0 : i32
    return %c0_i32, %c0_i32_0 : i32, i32
  }
  func.func @transform_9(%arg0: i32) -> (i32, i32) {
    %c0_i32 = arith.constant 0 : i32
    %c0_i32_0 = arith.constant 0 : i32
    return %arg0, %c0_i32 : i32, i32
  }
}

</mosaic_0001>

<bundles_post_ra>
// kernel: lstm_model_forward.1
= control target key start
LH: loop header
LB: loop body
LE: loop exit
PB: predicated region body
PF: predicated region fallthrough
CT: control target
= control target key end

     0   :  { %vm111_vm0 = vcmask 1041408   ;;  %v2501_v0 = vmov 0.0   ;;  %vm2502_vm1 = vmmov 0   ;;  %vm107_vm2 = vcmask 31744   ;;  %s2504_s18 = smov 64   ;;  %s2505_s19 = smov 32   ;;  %s3002_s2 = inlined_call_operand.vmem [shape: bf16[32,128], index: 2, kind: input, shape index: {}]   ;;  %s3003_s1 = inlined_call_operand.vmem [shape: bf16[4,128], index: 1, kind: input, shape index: {}]   ;;  %s3004_s0 = inlined_call_operand.vmem [shape: bf16[8,8,4], index: 0, kind: input, shape index: {}]   ;;  %s3005_s3 = inlined_call_operand.vmem [shape: f32[1,128], index: 3, kind: input, shape index: {}]   ;;  %s3006_s5 = inlined_call_operand.vmem [shape: bf16[32,128], index: 5, kind: input, shape index: {}]   ;;  %s3007_s4 = inlined_call_operand.vmem [shape: bf16[32,128], index: 4, kind: input, shape index: {}]   ;;  %s3008_s6 = inlined_call_operand.vmem [shape: f32[1,128], index: 6, kind: input, shape index: {}]   ;;  %s3009_s7 = inlined_call_operand.vmem [shape: f32[1,32], index: 7, kind: input, shape index: {}]   ;;  %s3010_s8 = inlined_call_operand.<no memory space> [shape: f32[1,1], index: 8, kind: input, shape index: {}]   ;;  %s3011_s9 = inlined_call_operand.vmem [shape: f32[8,1], index: 9, kind: output, shape index: {}]  }
   0x1   :  { %2113 = vmatprep.subr.bf16.mxu0 %v2501_v0  ;;  %v2561_v1 = vld [vmem:[%s3002_s2] sm:$0xff]   ;;  %2121 = vmatprep.subr.bf16.mxu1 %v2501_v0  ;;  %v2577_v4 = vld [vmem:[%s3002_s2 + $0x8] sm:$0xff]   ;;  %v2503_v6 = vmov 0   ;;  %vm63_vm3 = vcmask 261120   ;;  %vm1956_vm4 = vcmask 7168  }
   0x2   :  { %v35_v2 = vld [vmem:[%s3003_s1] sm:$0x3]  ;;  %2123 = vmatprep.mubr.msk.bf16.mxu1 %vm2502_vm1, %v2501_v0  ;;  %2117 = vmatprep.mubr.msk.bf16.mxu0 %vm2502_vm1, %v2501_v0  ;;  %v2611_v29 = vld [vmem:[%s3006_s5 + $0x8] sm:$0xff]   ;;  %v1974_v41 = vld [vmem:[%s3004_s0 + $0x4] sm:$0xf]  ;;  %s2506_s1 = smov 96  }
   0x3   :  { %2114 = vmatpush3.bf16.msra.mxu0 %v2561_v1  ;;  %v2572_v3 = vsel %vm111_vm0, %v35_v2, 0  ;;  %v50_v5 = vld [vmem:[%s3004_s0] sm:$0xf]  ;;  %v2624_v31 = vld [vmem:[%s3007_s4 + $0x8] sm:$0xff]  }
   0x4   :  { %2122 = vmatpush3.bf16.msra.mxu1 %v2572_v3  ;;  %2115 = vmatprep.subr.bf16.mxu0 %v2501_v0  ;;  %v2595_v10 = vld [vmem:[%s3005_s3] ss:$0 sm:$0xff] }
   0x5   :  { %2127 = vmatprep.subr.bf16.mxu1 %v2501_v0  ;;  %v2606_v28 = vld [vmem:[%s3006_s5] sm:$0xff]  }
   0x6   :  { %v2617_v30 = vld [vmem:[%s3007_s4] sm:$0xff]  }
   0x7   :  { %2116 = vmatpush3.bf16.msra.mxu0 %v2577_v4  ;;  %2124 = vmatmul.mubr.msk.bf16.vlgmr.msra.gmra.mrb[0].mxu1 %vm107_vm2, %v50_v5  ;;  %v2664_v42 = vld [vmem:[%s3008_s6] ss:$0 sm:$0xff] }
   0x8   :  { %2131 = vmatprep.mubr.msk.bf16.mxu1 %vm2502_vm1, %v2501_v0  ;;  %2135 = vmatprep.subr.bf16.mxu0 %v2501_v0 }
   0x9   :  { %2128 = vmatpush3.bf16.msra.mxu1 %v2606_v28 }
   0xa   :  { %2118 = vmatmul.mubr.bf16.vlgmr.msra.gmra.mrb[0].mxu0 %v2503_v6  ;;  %2129 = vmatprep.subr.bf16.mxu1 %v2501_v0 }
   0xb   :  { %2139 = vmatprep.mubr.msk.bf16.mxu0 %vm2502_vm1, %v2501_v0  ;;  %2136 = vmatpush3.bf16.msra.mxu0 %v2617_v30 }
   0xc   :  { %2137 = vmatprep.subr.bf16.mxu0 %v2501_v0 }
   0xd   :  { %2130 = vmatpush3.bf16.msra.mxu1 %v2611_v29 }
   0xe   :  { %2143 = vmatprep.subr.bf16.mxu1 %v2501_v0 }
   0xf   :  { %2138 = vmatpush3.bf16.msra.mxu0 %v2624_v31 }
  0x10   :  { %2132 = vmatmul.mubr.bf16.vlgmr.msra.gmra.mrb[4].mxu1 %v2503_v6  ;;  %2151 = vmatprep.subr.bf16.mxu0 %v2501_v0 }
  0x11   :  { %2144 = vmatpush3.bf16.msra.mxu1 %v2561_v1  ;;  %2147 = vmatprep.mubr.msk.bf16.mxu1 %vm2502_vm1, %v2501_v0 }
  0x12   :  { %2145 = vmatprep.subr.bf16.mxu1 %v2501_v0 }
  0x15   :  { %2146 = vmatpush3.bf16.msra.mxu1 %v2577_v4 }
  0x16   :  { %2157 = vmatprep.subr.bf16.mxu1 %v2501_v0 }
  0xda   :  { %v149_v7 = vpop.f32.mrb[0].mxu1 }
  0xdb   :  { %v2125_v8 = vpop.f32.mrb[1].mxu1 }
  0xdc   :  { %v152_v9 = vpop.f32.mrb[2].mxu1 }
  0xdd   :  { %v101_v11 = vpop.f32.mrb[0].mxu0  ;;  %v2126_v12 = vpop.f32.mrb[3].mxu1 }
  0xde   :  { %v150_v13 = vadd.f32 %v149_v7, %v101_v11  ;;  %v2119_v14 = vpop.f32.mrb[1].mxu0 }
  0xdf   :  { %v104_v15 = vpop.f32.mrb[2].mxu0 }
  0xe0   :  { %v161_v16 = vadd.f32 %v2595_v10, %v150_v13  ;;  %v2120_v17 = vpop.f32.mrb[3].mxu0 }
  0xe2   :  { %2365 = vtanh.f32 %v161_v16  ;;  %v1966_v19 = vmul.f32 -1.442695, %v161_v16 }
  0xe3   :  { %v233_v36 = vpop.f32.mrb[4].mxu1 }
  0xe4   :  { %2367 = vpow2.f32 %v1966_v19  ;;  %v2133_v37 = vpop.f32.mrb[5].mxu1 }
  0xe5   :  { %v236_v38 = vpop.f32.mrb[6].mxu1 }
  0xe6   :  { %v2134_v39 = vpop.f32.mrb[7].mxu1 }
  0xec   :  { %v2366_v18 = vpop.eup %2365 }
  0xed   :  { %171 = vrot.lane.b32.xlu0 %v2366_v18, %s2504_s18 }
  0xee   :  { %v2368_v20 = vpop.eup %2367 }
  0xef   :  { %v165_v21 = vadd.f32 1.0, %v2368_v20 }
  0xf1   :  { %2369 = vrcp.f32 %v165_v21 }
  0xfb   :  { %v2370_v22 = vpop.eup %2369 }
  0xfc   :  { %v169_v25 = vmul.f32 0.0, %v2370_v22 }
 0x15f   :  { %v172_v23 = vpop.permute.xlu0 %171 }
 0x160   :  { %v174_v24 = vmul.f32 %v2370_v22, %v172_v23 }
 0x162   :  { %176 = vrot.lane.b32.xlu0 %v174_v24, %s2505_s19 }
 0x1d4   :  { %v177_v26 = vpop.permute.xlu0 %176 }
 0x1d5   :  { %v2600_v27 = vadd.f32 %v177_v26, %v169_v25 }
 0x1d7   :  { %2371 = vtanh.f32 %v2600_v27 }
 0x1e1   :  { %v2372_v32 = vpop.eup %2371 }
 0x1e2   :  { %182 = vrot.lane.b32.xlu1 %v2372_v32, %s2504_s18 }
 0x254   :  { %v183_v33 = vpop.permute.xlu1 %182 }
 0x255   :  { %v185_v34 = vmul.f32 %v2370_v22, %v183_v33 }
 0x257   :  { %v186_v35 = vpack.c.bf16 %v185_v34, %v185_v34  ;;  %v1981_v34 = vld [vmem:[%s3004_s0 + $0x8] sm:$0xf] }
 0x259   :  { %240 = vrot.lane.b32.xlu1 %v186_v35, %s2505_s19 }
 0x2cb   :  { %v241_v40 = vpop.permute.xlu1 %240 }
 0x2cc   :  { %2140 = vmatmul.mubr.msk.bf16.vlgmr.msra.gmra.mrb[4].mxu0 %vm63_vm3, %v241_v40  ;;  %2148 = vmatmul.mubr.msk.bf16.vlgmr.msra.gmra.mrb[8].mxu1 %vm63_vm3, %v241_v40 }
 0x2cd   :  { %2152 = vmatpush3.bf16.msra.mxu0 %v2572_v3  ;;  %2153 = vmatprep.mubr.msk.bf16.mxu0 %vm2502_vm1, %v2501_v0 }
 0x2ce   :  { %2158 = vmatpush3.bf16.msra.mxu1 %v2606_v28  ;;  %2161 = vmatprep.mubr.msk.bf16.mxu1 %vm2502_vm1, %v2501_v0 }
 0x2cf   :  { %2159 = vmatprep.subr.bf16.mxu1 %v2501_v0  ;;  %2165 = vmatprep.subr.bf16.mxu0 %v2501_v0 }
 0x2d2   :  { %2160 = vmatpush3.bf16.msra.mxu1 %v2611_v29 }
 0x2d3   :  { %2173 = vmatprep.subr.bf16.mxu1 %v2501_v0 }
 0x2d4   :  { %2154 = vmatmul.mubr.msk.bf16.vlgmr.msra.gmra.mrb[8].mxu0 %vm107_vm2, %v1974_v41 }
 0x2d5   :  { %2166 = vmatpush3.bf16.msra.mxu0 %v2617_v30  ;;  %2169 = vmatprep.mubr.msk.bf16.mxu0 %vm2502_vm1, %v2501_v0 }
 0x2d6   :  { %2167 = vmatprep.subr.bf16.mxu0 %v2501_v0 }
 0x2d9   :  { %2168 = vmatpush3.bf16.msra.mxu0 %v2624_v31 }
 0x2da   :  { %2181 = vmatprep.subr.bf16.mxu0 %v2501_v0 }
 0x39f   :  { %v291_v43 = vpop.f32.mrb[4].mxu0  ;;  %v364_v44 = vpop.f32.mrb[8].mxu1 }
 0x3a0   :  { %v292_v45 = vadd.f32 %v291_v43, %v233_v36  ;;  %v2141_v46 = vpop.f32.mrb[5].mxu0  ;;  %v2149_v47 = vpop.f32.mrb[9].mxu1 }
 0x3a1   :  { %v294_v48 = vpop.f32.mrb[6].mxu0  ;;  %v367_v49 = vpop.f32.mrb[10].mxu1 }
 0x3a2   :  { %v303_v50 = vadd.f32 %v2664_v42, %v292_v45  ;;  %v2142_v51 = vpop.f32.mrb[7].mxu0  ;;  %v2150_v52 = vpop.f32.mrb[11].mxu1 }
 0x3a4   :  { %2373 = vtanh.f32 %v303_v50  ;;  %v1973_v61 = vmul.f32 -1.442695, %v303_v50 }
 0x3a7   :  { %v407_v53 = vpop.f32.mrb[8].mxu0 }
 0x3a8   :  { %v408_v54 = vadd.f32 %v407_v53, %v364_v44  ;;  %v2155_v55 = vpop.f32.mrb[9].mxu0 }
 0x3a9   :  { %v410_v56 = vpop.f32.mrb[10].mxu0 }
 0x3aa   :  { %v413_v57 = vadd.f32 %v2595_v10, %v408_v54  ;;  %v2156_v58 = vpop.f32.mrb[11].mxu0 }
 0x3ac   :  { %2375 = vtanh.f32 %v413_v57  ;;  %v1977_v62 = vmul.f32 -1.442695, %v413_v57 }
 0x3ad   :  { %2377 = vpow2.f32 %v1973_v61 }
 0x3ae   :  { %v2374_v59 = vpop.eup %2373  ;;  %2379 = vpow2.f32 %v1977_v62 }
 0x3af   :  { %313 = vrot.lane.b32.xlu0 %v2374_v59, %s2504_s18 }
 0x3b6   :  { %v2376_v60 = vpop.eup %2375 }
 0x3b7   :  { %423 = vrot.lane.b32.xlu1 %v2376_v60, %s2504_s18  ;;  %v2378_v63 = vpop.eup %2377 }
 0x3b8   :  { %v307_v2 = vadd.f32 1.0, %v2378_v63  ;;  %v2380_v5 = vpop.eup %2379 }
 0x3b9   :  { %v417_v6 = vadd.f32 1.0, %v2380_v5 }
 0x3ba   :  { %2381 = vrcp.f32 %v307_v2 }
 0x3bb   :  { %2383 = vrcp.f32 %v417_v6 }
 0x3c4   :  { %v2382_v7 = vpop.eup %2381 }
 0x3c5   :  { %v2384_v11 = vpop.eup %2383  ;;  %v311_v14 = vmul.f32 0.0, %v2382_v7 }
 0x3c6   :  { %v421_v17 = vmul.f32 %v2384_v11, %v2600_v27 }
 0x421   :  { %v314_v8 = vpop.permute.xlu0 %313 }
 0x422   :  { %v316_v9 = vmul.f32 %v2382_v7, %v314_v8 }
 0x424   :  { %318 = vrot.lane.b32.xlu0 %v316_v9, %s2505_s19 }
 0x429   :  { %v424_v12 = vpop.permute.xlu1 %423 }
 0x42a   :  { %v426_v13 = vmul.f32 %v2384_v11, %v424_v12 }
 0x42c   :  { %428 = vrot.lane.b32.xlu1 %v426_v13, %s2505_s19 }
 0x496   :  { %v319_v15 = vpop.permute.xlu0 %318 }
 0x497   :  { %v2672_v16 = vadd.f32 %v319_v15, %v311_v14 }
 0x499   :  { %2385 = vtanh.f32 %v2672_v16 }
 0x49e   :  { %v429_v18 = vpop.permute.xlu1 %428 }
 0x49f   :  { %v2676_v19 = vadd.f32 %v429_v18, %v421_v17 }
 0x4a1   :  { %2387 = vtanh.f32 %v2676_v19 }
 0x4a3   :  { %v2386_v20 = vpop.eup %2385 }
 0x4a4   :  { %324 = vrot.lane.b32.xlu0 %v2386_v20, %s2504_s18 }
 0x4ab   :  { %v2388_v21 = vpop.eup %2387 }
 0x4ac   :  { %434 = vrot.lane.b32.xlu1 %v2388_v21, %s2504_s18 }
 0x516   :  { %v325_v22 = vpop.permute.xlu0 %324 }
 0x517   :  { %v327_v23 = vmul.f32 %v2382_v7, %v325_v22 }
 0x519   :  { %v439_v24 = vpack.c.bf16 %v327_v23, %v327_v23 }
 0x51b   :  { %441 = vrot.lane.b32.xlu0 %v439_v24, %s2505_s19 }
 0x51e   :  { %v435_v25 = vpop.permute.xlu1 %434 }
 0x51f   :  { %v437_v26 = vmul.f32 %v2384_v11, %v435_v25 }
 0x521   :  { %v438_v32 = vpack.c.bf16 %v437_v26, %v437_v26 }
 0x523   :  { %487 = vrot.lane.b32.xlu1 %v438_v32, %s2505_s19  ;;  %v1988_v32 = vld [vmem:[%s3004_s0 + $0xc] sm:$0xf] }
 0x58d   :  { %v442_v27 = vpop.permute.xlu0 %441 }
 0x58e   :  { %2162 = vmatmul.mubr.msk.bf16.vlgmr.msra.gmra.mrb[12].mxu1 %vm63_vm3, %v442_v27 }
 0x58f   :  { %2174 = vmatpush3.bf16.msra.mxu1 %v2561_v1  ;;  %2177 = vmatprep.mubr.msk.bf16.mxu1 %vm2502_vm1, %v2501_v0 }
 0x590   :  { %2175 = vmatprep.subr.bf16.mxu1 %v2501_v0 }
 0x593   :  { %2176 = vmatpush3.bf16.msra.mxu1 %v2577_v4 }
 0x594   :  { %2187 = vmatprep.subr.bf16.mxu1 %v2501_v0 }
 0x595   :  { %v488_v33 = vpop.permute.xlu1 %487 }
 0x596   :  { %2170 = vmatmul.mubr.msk.bf16.vlgmr.msra.gmra.mrb[12].mxu0 %vm63_vm3, %v488_v33  ;;  %2178 = vmatmul.mubr.msk.bf16.vlgmr.msra.gmra.mrb[16].mxu1 %vm63_vm3, %v488_v33 }
 0x597   :  { %2182 = vmatpush3.bf16.msra.mxu0 %v2572_v3  ;;  %2183 = vmatprep.mubr.msk.bf16.mxu0 %vm2502_vm1, %v2501_v0 }
 0x598   :  { %2188 = vmatpush3.bf16.msra.mxu1 %v2606_v28  ;;  %2191 = vmatprep.mubr.msk.bf16.mxu1 %vm2502_vm1, %v2501_v0 }
 0x599   :  { %2189 = vmatprep.subr.bf16.mxu1 %v2501_v0  ;;  %2195 = vmatprep.subr.bf16.mxu0 %v2501_v0 }
 0x59c   :  { %2190 = vmatpush3.bf16.msra.mxu1 %v2611_v29 }
 0x59d   :  { %2203 = vmatprep.subr.bf16.mxu1 %v2501_v0 }
 0x59e   :  { %2184 = vmatmul.mubr.msk.bf16.vlgmr.msra.gmra.mrb[16].mxu0 %vm107_vm2, %v1981_v34 }
 0x59f   :  { %2196 = vmatpush3.bf16.msra.mxu0 %v2617_v30  ;;  %2199 = vmatprep.mubr.msk.bf16.mxu0 %vm2502_vm1, %v2501_v0 }
 0x5a0   :  { %2197 = vmatprep.subr.bf16.mxu0 %v2501_v0 }
 0x5a3   :  { %2198 = vmatpush3.bf16.msra.mxu0 %v2624_v31 }
 0x5a4   :  { %2211 = vmatprep.subr.bf16.mxu0 %v2501_v0 }
 0x661   :  { %v480_v35 = vpop.f32.mrb[12].mxu1 }
 0x662   :  { %v2163_v36 = vpop.f32.mrb[13].mxu1 }
 0x663   :  { %v483_v37 = vpop.f32.mrb[14].mxu1 }
 0x664   :  { %v2164_v38 = vpop.f32.mrb[15].mxu1 }
 0x669   :  { %v526_v39 = vpop.f32.mrb[12].mxu0  ;;  %v593_v40 = vpop.f32.mrb[16].mxu1 }
 0x66a   :  { %v527_v41 = vadd.f32 %v526_v39, %v480_v35  ;;  %v2171_v43 = vpop.f32.mrb[13].mxu0  ;;  %v2179_v44 = vpop.f32.mrb[17].mxu1 }
 0x66b   :  { %v529_v45 = vpop.f32.mrb[14].mxu0  ;;  %v596_v46 = vpop.f32.mrb[18].mxu1 }
 0x66c   :  { %v532_v47 = vadd.f32 %v2664_v42, %v527_v41  ;;  %v2172_v48 = vpop.f32.mrb[15].mxu0  ;;  %v2180_v49 = vpop.f32.mrb[19].mxu1 }
 0x66e   :  { %2389 = vtanh.f32 %v532_v47  ;;  %v1980_v58 = vmul.f32 -1.442695, %v532_v47 }
 0x671   :  { %v636_v50 = vpop.f32.mrb[16].mxu0 }
 0x672   :  { %v637_v51 = vadd.f32 %v636_v50, %v593_v40  ;;  %v2185_v52 = vpop.f32.mrb[17].mxu0 }
 0x673   :  { %v639_v53 = vpop.f32.mrb[18].mxu0 }
 0x674   :  { %v642_v54 = vadd.f32 %v2595_v10, %v637_v51  ;;  %v2186_v55 = vpop.f32.mrb[19].mxu0 }
 0x676   :  { %2391 = vtanh.f32 %v642_v54  ;;  %v1984_v59 = vmul.f32 -1.442695, %v642_v54 }
 0x677   :  { %2393 = vpow2.f32 %v1980_v58 }
 0x678   :  { %v2390_v56 = vpop.eup %2389  ;;  %2395 = vpow2.f32 %v1984_v59 }
 0x679   :  { %542 = vrot.lane.b32.xlu0 %v2390_v56, %s2504_s18 }
 0x680   :  { %v2392_v57 = vpop.eup %2391 }
 0x681   :  { %652 = vrot.lane.b32.xlu1 %v2392_v57, %s2504_s18  ;;  %v2394_v60 = vpop.eup %2393 }
 0x682   :  { %v536_v61 = vadd.f32 1.0, %v2394_v60  ;;  %v2396_v62 = vpop.eup %2395 }
 0x683   :  { %v646_v63 = vadd.f32 1.0, %v2396_v62 }
 0x684   :  { %2397 = vrcp.f32 %v536_v61 }
 0x685   :  { %2399 = vrcp.f32 %v646_v63 }
 0x68e   :  { %v2398_v2 = vpop.eup %2397 }
 0x68f   :  { %v2400_v7 = vpop.eup %2399  ;;  %v540_v11 = vmul.f32 %v2398_v2, %v2672_v16 }
 0x690   :  { %v650_v14 = vmul.f32 %v2400_v7, %v2676_v19 }
 0x6eb   :  { %v543_v5 = vpop.permute.xlu0 %542 }
 0x6ec   :  { %v545_v6 = vmul.f32 %v2398_v2, %v543_v5 }
 0x6ee   :  { %547 = vrot.lane.b32.xlu0 %v545_v6, %s2505_s19 }
 0x6f3   :  { %v653_v8 = vpop.permute.xlu1 %652 }
 0x6f4   :  { %v655_v9 = vmul.f32 %v2400_v7, %v653_v8 }
 0x6f6   :  { %657 = vrot.lane.b32.xlu1 %v655_v9, %s2505_s19 }
 0x760   :  { %v548_v12 = vpop.permute.xlu0 %547 }
 0x761   :  { %v2719_v13 = vadd.f32 %v548_v12, %v540_v11 }
 0x763   :  { %2401 = vtanh.f32 %v2719_v13 }
 0x768   :  { %v658_v15 = vpop.permute.xlu1 %657 }
 0x769   :  { %v2723_v17 = vadd.f32 %v658_v15, %v650_v14 }
 0x76b   :  { %2403 = vtanh.f32 %v2723_v17 }
 0x76d   :  { %v2402_v18 = vpop.eup %2401 }
 0x76e   :  { %553 = vrot.lane.b32.xlu0 %v2402_v18, %s2504_s18 }
 0x775   :  { %v2404_v20 = vpop.eup %2403 }
 0x776   :  { %663 = vrot.lane.b32.xlu1 %v2404_v20, %s2504_s18 }
 0x7e0   :  { %v554_v21 = vpop.permute.xlu0 %553 }
 0x7e1   :  { %v556_v16 = vmul.f32 %v2398_v2, %v554_v21 }
 0x7e3   :  { %v668_v22 = vpack.c.bf16 %v556_v16, %v556_v16 }
 0x7e5   :  { %670 = vrot.lane.b32.xlu0 %v668_v22, %s2505_s19 }
 0x7e8   :  { %v664_v23 = vpop.permute.xlu1 %663 }
 0x7e9   :  { %v666_v24 = vmul.f32 %v2400_v7, %v664_v23 }
 0x7eb   :  { %v667_v25 = vpack.c.bf16 %v666_v24, %v666_v24 }
 0x7ed   :  { %716 = vrot.lane.b32.xlu1 %v667_v25, %s2505_s19  ;;  %v1995_v25 = vld [vmem:[%s3004_s0 + $0x10] sm:$0xf] }
 0x857   :  { %v671_v19 = vpop.permute.xlu0 %670 }
 0x858   :  { %2192 = vmatmul.mubr.msk.bf16.vlgmr.msra.gmra.mrb[20].mxu1 %vm63_vm3, %v671_v19 }
 0x859   :  { %2204 = vmatpush3.bf16.msra.mxu1 %v2561_v1  ;;  %2207 = vmatprep.mubr.msk.bf16.mxu1 %vm2502_vm1, %v2501_v0 }
 0x85a   :  { %2205 = vmatprep.subr.bf16.mxu1 %v2501_v0 }
 0x85d   :  { %2206 = vmatpush3.bf16.msra.mxu1 %v2577_v4 }
 0x85e   :  { %2217 = vmatprep.subr.bf16.mxu1 %v2501_v0 }
 0x85f   :  { %v717_v26 = vpop.permute.xlu1 %716 }
 0x860   :  { %2200 = vmatmul.mubr.msk.bf16.vlgmr.msra.gmra.mrb[20].mxu0 %vm63_vm3, %v717_v26  ;;  %2208 = vmatmul.mubr.msk.bf16.vlgmr.msra.gmra.mrb[24].mxu1 %vm63_vm3, %v717_v26 }
 0x861   :  { %2212 = vmatpush3.bf16.msra.mxu0 %v2572_v3  ;;  %2213 = vmatprep.mubr.msk.bf16.mxu0 %vm2502_vm1, %v2501_v0 }
 0x862   :  { %2218 = vmatpush3.bf16.msra.mxu1 %v2606_v28  ;;  %2221 = vmatprep.mubr.msk.bf16.mxu1 %vm2502_vm1, %v2501_v0 }
 0x863   :  { %2219 = vmatprep.subr.bf16.mxu1 %v2501_v0  ;;  %2225 = vmatprep.subr.bf16.mxu0 %v2501_v0 }
 0x866   :  { %2220 = vmatpush3.bf16.msra.mxu1 %v2611_v29 }
 0x867   :  { %2233 = vmatprep.subr.bf16.mxu1 %v2501_v0 }
 0x868   :  { %2214 = vmatmul.mubr.msk.bf16.vlgmr.msra.gmra.mrb[24].mxu0 %vm107_vm2, %v1988_v32 }
 0x869   :  { %2226 = vmatpush3.bf16.msra.mxu0 %v2617_v30  ;;  %2229 = vmatprep.mubr.msk.bf16.mxu0 %vm2502_vm1, %v2501_v0 }
 0x86a   :  { %2227 = vmatprep.subr.bf16.mxu0 %v2501_v0 }
 0x86d   :  { %2228 = vmatpush3.bf16.msra.mxu0 %v2624_v31 }
 0x86e   :  { %2241 = vmatprep.subr.bf16.mxu0 %v2501_v0 }
 0x92b   :  { %v709_v27 = vpop.f32.mrb[20].mxu1 }
 0x92c   :  { %v2193_v33 = vpop.f32.mrb[21].mxu1 }
 0x92d   :  { %v712_v34 = vpop.f32.mrb[22].mxu1 }
 0x92e   :  { %v2194_v35 = vpop.f32.mrb[23].mxu1 }
 0x933   :  { %v755_v36 = vpop.f32.mrb[20].mxu0  ;;  %v822_v37 = vpop.f32.mrb[24].mxu1 }
 0x934   :  { %v756_v38 = vadd.f32 %v755_v36, %v709_v27  ;;  %v2201_v39 = vpop.f32.mrb[21].mxu0  ;;  %v2209_v40 = vpop.f32.mrb[25].mxu1 }
 0x935   :  { %v758_v41 = vpop.f32.mrb[22].mxu0  ;;  %v825_v43 = vpop.f32.mrb[26].mxu1 }
 0x936   :  { %v761_v44 = vadd.f32 %v2664_v42, %v756_v38  ;;  %v2202_v45 = vpop.f32.mrb[23].mxu0  ;;  %v2210_v46 = vpop.f32.mrb[27].mxu1 }
 0x938   :  { %2405 = vtanh.f32 %v761_v44  ;;  %v1987_v55 = vmul.f32 -1.442695, %v761_v44 }
 0x93b   :  { %v865_v47 = vpop.f32.mrb[24].mxu0 }
 0x93c   :  { %v866_v48 = vadd.f32 %v865_v47, %v822_v37  ;;  %v2215_v49 = vpop.f32.mrb[25].mxu0 }
 0x93d   :  { %v868_v50 = vpop.f32.mrb[26].mxu0 }
 0x93e   :  { %v871_v51 = vadd.f32 %v2595_v10, %v866_v48  ;;  %v2216_v52 = vpop.f32.mrb[27].mxu0 }
 0x940   :  { %2407 = vtanh.f32 %v871_v51  ;;  %v1991_v56 = vmul.f32 -1.442695, %v871_v51 }
 0x941   :  { %2409 = vpow2.f32 %v1987_v55 }
 0x942   :  { %v2406_v53 = vpop.eup %2405  ;;  %2411 = vpow2.f32 %v1991_v56 }
 0x943   :  { %771 = vrot.lane.b32.xlu0 %v2406_v53, %s2504_s18 }
 0x94a   :  { %v2408_v54 = vpop.eup %2407 }
 0x94b   :  { %881 = vrot.lane.b32.xlu1 %v2408_v54, %s2504_s18  ;;  %v2410_v57 = vpop.eup %2409 }
 0x94c   :  { %v765_v58 = vadd.f32 1.0, %v2410_v57  ;;  %v2412_v59 = vpop.eup %2411 }
 0x94d   :  { %v875_v60 = vadd.f32 1.0, %v2412_v59 }
 0x94e   :  { %2413 = vrcp.f32 %v765_v58 }
 0x94f   :  { %2415 = vrcp.f32 %v875_v60 }
 0x958   :  { %v2414_v61 = vpop.eup %2413 }
 0x959   :  { %v2416_v2 = vpop.eup %2415  ;;  %v769_v7 = vmul.f32 %v2414_v61, %v2719_v13 }
 0x95a   :  { %v879_v11 = vmul.f32 %v2416_v2, %v2723_v17 }
 0x9b5   :  { %v772_v62 = vpop.permute.xlu0 %771 }
 0x9b6   :  { %v774_v63 = vmul.f32 %v2414_v61, %v772_v62 }
 0x9b8   :  { %776 = vrot.lane.b32.xlu0 %v774_v63, %s2505_s19 }
 0x9bd   :  { %v882_v5 = vpop.permute.xlu1 %881 }
 0x9be   :  { %v884_v6 = vmul.f32 %v2416_v2, %v882_v5 }
 0x9c0   :  { %886 = vrot.lane.b32.xlu1 %v884_v6, %s2505_s19 }
 0xa2a   :  { %v777_v8 = vpop.permute.xlu0 %776 }
 0xa2b   :  { %v2766_v9 = vadd.f32 %v777_v8, %v769_v7 }
 0xa2d   :  { %2417 = vtanh.f32 %v2766_v9 }
 0xa32   :  { %v887_v12 = vpop.permute.xlu1 %886 }
 0xa33   :  { %v2770_v14 = vadd.f32 %v887_v12, %v879_v11 }
 0xa35   :  { %2419 = vtanh.f32 %v2770_v14 }
 0xa37   :  { %v2418_v15 = vpop.eup %2417 }
 0xa38   :  { %782 = vrot.lane.b32.xlu0 %v2418_v15, %s2504_s18 }
 0xa3f   :  { %v2420_v18 = vpop.eup %2419 }
 0xa40   :  { %892 = vrot.lane.b32.xlu1 %v2420_v18, %s2504_s18 }
 0xaaa   :  { %v783_v20 = vpop.permute.xlu0 %782 }
 0xaab   :  { %v785_v13 = vmul.f32 %v2414_v61, %v783_v20 }
 0xaad   :  { %v897_v21 = vpack.c.bf16 %v785_v13, %v785_v13 }
 0xaaf   :  { %899 = vrot.lane.b32.xlu0 %v897_v21, %s2505_s19 }
 0xab2   :  { %v893_v16 = vpop.permute.xlu1 %892 }
 0xab3   :  { %v895_v22 = vmul.f32 %v2416_v2, %v893_v16 }
 0xab5   :  { %v896_v23 = vpack.c.bf16 %v895_v22, %v895_v22 }
 0xab7   :  { %945 = vrot.lane.b32.xlu1 %v896_v23, %s2505_s19 }
 0xb21   :  { %v900_v17 = vpop.permute.xlu0 %899 }
 0xb22   :  { %2222 = vmatmul.mubr.msk.bf16.vlgmr.msra.gmra.mrb[28].mxu1 %vm63_vm3, %v900_v17 }
 0xb23   :  { %2234 = vmatpush3.bf16.msra.mxu1 %v2561_v1  ;;  %2237 = vmatprep.mubr.msk.bf16.mxu1 %vm2502_vm1, %v2501_v0 }
 0xb24   :  { %2235 = vmatprep.subr.bf16.mxu1 %v2501_v0 }
 0xb27   :  { %2236 = vmatpush3.bf16.msra.mxu1 %v2577_v4 }
 0xb28   :  { %2247 = vmatprep.subr.bf16.mxu1 %v2501_v0 }
 0xb29   :  { %v946_v24 = vpop.permute.xlu1 %945 }
 0xb2a   :  { %2230 = vmatmul.mubr.msk.bf16.vlgmr.msra.gmra.mrb[28].mxu0 %vm63_vm3, %v946_v24  ;;  %2238 = vmatmul.mubr.msk.bf16.vlgmr.msra.gmra.mrb[32].mxu1 %vm63_vm3, %v946_v24 }
 0xb2b   :  { %2242 = vmatpush3.bf16.msra.mxu0 %v2572_v3  ;;  %2243 = vmatprep.mubr.msk.bf16.mxu0 %vm2502_vm1, %v2501_v0 }
 0xb2c   :  { %2248 = vmatpush3.bf16.msra.mxu1 %v2606_v28  ;;  %2251 = vmatprep.mubr.msk.bf16.mxu1 %vm2502_vm1, %v2501_v0 }
 0xb2d   :  { %2249 = vmatprep.subr.bf16.mxu1 %v2501_v0  ;;  %2255 = vmatprep.subr.bf16.mxu0 %v2501_v0 }
 0xb30   :  { %2250 = vmatpush3.bf16.msra.mxu1 %v2611_v29 }
 0xb31   :  { %2263 = vmatprep.subr.bf16.mxu1 %v2501_v0 }
 0xb32   :  { %2244 = vmatmul.mubr.msk.bf16.vlgmr.msra.gmra.mrb[32].mxu0 %vm107_vm2, %v1995_v25 }
 0xb33   :  { %2256 = vmatpush3.bf16.msra.mxu0 %v2617_v30  ;;  %2259 = vmatprep.mubr.msk.bf16.mxu0 %vm2502_vm1, %v2501_v0 }
 0xb34   :  { %2257 = vmatprep.subr.bf16.mxu0 %v2501_v0 }
 0xb37   :  { %2258 = vmatpush3.bf16.msra.mxu0 %v2624_v31 }
 0xb38   :  { %2271 = vmatprep.subr.bf16.mxu0 %v2501_v0 }
 0xbf5   :  { %v938_v19 = vpop.f32.mrb[28].mxu1 }
 0xbf6   :  { %v2223_v26 = vpop.f32.mrb[29].mxu1 }
 0xbf7   :  { %v941_v32 = vpop.f32.mrb[30].mxu1 }
 0xbf8   :  { %v2224_v27 = vpop.f32.mrb[31].mxu1 }
 0xbfd   :  { %v984_v33 = vpop.f32.mrb[28].mxu0  ;;  %v1051_v34 = vpop.f32.mrb[32].mxu1 }
 0xbfe   :  { %v985_v35 = vadd.f32 %v984_v33, %v938_v19  ;;  %v2231_v36 = vpop.f32.mrb[29].mxu0  ;;  %v2239_v37 = vpop.f32.mrb[33].mxu1 }
 0xbff   :  { %v987_v38 = vpop.f32.mrb[30].mxu0  ;;  %v1054_v39 = vpop.f32.mrb[34].mxu1 }
 0xc00   :  { %v990_v40 = vadd.f32 %v2664_v42, %v985_v35  ;;  %v2232_v41 = vpop.f32.mrb[31].mxu0  ;;  %v2240_v43 = vpop.f32.mrb[35].mxu1 }
 0xc02   :  { %2421 = vtanh.f32 %v990_v40  ;;  %v1994_v52 = vmul.f32 -1.442695, %v990_v40 }
 0xc05   :  { %v1094_v44 = vpop.f32.mrb[32].mxu0 }
 0xc06   :  { %v1095_v45 = vadd.f32 %v1094_v44, %v1051_v34  ;;  %v2245_v46 = vpop.f32.mrb[33].mxu0 }
 0xc07   :  { %v1097_v47 = vpop.f32.mrb[34].mxu0 }
 0xc08   :  { %v1100_v48 = vadd.f32 %v2595_v10, %v1095_v45  ;;  %v2246_v49 = vpop.f32.mrb[35].mxu0 }
 0xc0a   :  { %2423 = vtanh.f32 %v1100_v48  ;;  %v1998_v53 = vmul.f32 -1.442695, %v1100_v48 }
 0xc0b   :  { %2425 = vpow2.f32 %v1994_v52 }
 0xc0c   :  { %v2422_v50 = vpop.eup %2421  ;;  %2427 = vpow2.f32 %v1998_v53 }
 0xc0d   :  { %1000 = vrot.lane.b32.xlu0 %v2422_v50, %s2504_s18 }
 0xc14   :  { %v2424_v51 = vpop.eup %2423 }
 0xc15   :  { %1110 = vrot.lane.b32.xlu1 %v2424_v51, %s2504_s18  ;;  %v2426_v54 = vpop.eup %2425 }
 0xc16   :  { %v994_v55 = vadd.f32 1.0, %v2426_v54  ;;  %v2428_v56 = vpop.eup %2427 }
 0xc17   :  { %v1104_v57 = vadd.f32 1.0, %v2428_v56 }
 0xc18   :  { %2429 = vrcp.f32 %v994_v55 }
 0xc19   :  { %2431 = vrcp.f32 %v1104_v57 }
 0xc22   :  { %v2430_v58 = vpop.eup %2429 }
 0xc23   :  { %v2432_v61 = vpop.eup %2431  ;;  %v998_v2 = vmul.f32 %v2430_v58, %v2766_v9 }
 0xc24   :  { %v1108_v7 = vmul.f32 %v2432_v61, %v2770_v14 }
 0xc7f   :  { %v1001_v59 = vpop.permute.xlu0 %1000 }
 0xc80   :  { %v1003_v60 = vmul.f32 %v2430_v58, %v1001_v59 }
 0xc82   :  { %1005 = vrot.lane.b32.xlu0 %v1003_v60, %s2505_s19 }
 0xc87   :  { %v1111_v62 = vpop.permute.xlu1 %1110 }
 0xc88   :  { %v1113_v63 = vmul.f32 %v2432_v61, %v1111_v62 }
 0xc8a   :  { %1115 = vrot.lane.b32.xlu1 %v1113_v63, %s2505_s19 }
 0xcf4   :  { %v1006_v5 = vpop.permute.xlu0 %1005 }
 0xcf5   :  { %v2813_v6 = vadd.f32 %v1006_v5, %v998_v2 }
 0xcf7   :  { %2433 = vtanh.f32 %v2813_v6 }
 0xcfc   :  { %v1116_v8 = vpop.permute.xlu1 %1115 }
 0xcfd   :  { %v2817_v11 = vadd.f32 %v1116_v8, %v1108_v7 }
 0xcff   :  { %2435 = vtanh.f32 %v2817_v11 }
 0xd01   :  { %v2434_v12 = vpop.eup %2433 }
 0xd02   :  { %1011 = vrot.lane.b32.xlu0 %v2434_v12, %s2504_s18 }
 0xd09   :  { %v2436_v15 = vpop.eup %2435 }
 0xd0a   :  { %1121 = vrot.lane.b32.xlu1 %v2436_v15, %s2504_s18 }
 0xd74   :  { %v1012_v18 = vpop.permute.xlu0 %1011 }
 0xd75   :  { %v1014_v9 = vmul.f32 %v2430_v58, %v1012_v18 }
 0xd77   :  { %v1126_v20 = vpack.c.bf16 %v1014_v9, %v1014_v9  ;;  %v2875_v9 = vld [vmem:[%s3002_s2] sm:$0xff]  }
 0xd79   :  { %1128 = vrot.lane.b32.xlu0 %v1126_v20, %s2505_s19  ;;  %v2884_v20 = vld [vmem:[%s3002_s2 + $0x8] sm:$0xff]  }
 0xd7c   :  { %v1122_v13 = vpop.permute.xlu1 %1121 }
 0xd7d   :  { %v1124_v21 = vmul.f32 %v2432_v61, %v1122_v13 }
 0xd7f   :  { %v1125_v16 = vpack.c.bf16 %v1124_v21, %v1124_v21  ;;  %v2009_v21 = vld [vmem:[%s3004_s0 + $0x18] sm:$0xf] }
 0xd81   :  { %1174 = vrot.lane.b32.xlu1 %v1125_v16, %s2505_s19 }
 0xdeb   :  { %v1129_v14 = vpop.permute.xlu0 %1128 }
 0xdec   :  { %2252 = vmatmul.mubr.msk.bf16.vlgmr.msra.gmra.mrb[36].mxu1 %vm63_vm3, %v1129_v14 }
 0xded   :  { %2264 = vmatpush3.bf16.msra.mxu1 %v2561_v1  ;;  %2267 = vmatprep.mubr.msk.bf16.mxu1 %vm2502_vm1, %v2501_v0  ;;  %v2002_v1 = vld [vmem:[%s3004_s0 + $0x14] sm:$0xf] }
 0xdee   :  { %2265 = vmatprep.subr.bf16.mxu1 %v2501_v0 }
 0xdf1   :  { %2266 = vmatpush3.bf16.msra.mxu1 %v2577_v4 }
 0xdf2   :  { %2277 = vmatprep.subr.bf16.mxu1 %v2501_v0 }
 0xdf3   :  { %v1175_v22 = vpop.permute.xlu1 %1174 }
 0xdf4   :  { %2260 = vmatmul.mubr.msk.bf16.vlgmr.msra.gmra.mrb[36].mxu0 %vm63_vm3, %v1175_v22  ;;  %2268 = vmatmul.mubr.msk.bf16.vlgmr.msra.gmra.mrb[40].mxu1 %vm63_vm3, %v1175_v22 }
 0xdf5   :  { %2272 = vmatpush3.bf16.msra.mxu0 %v2572_v3  ;;  %2273 = vmatprep.mubr.msk.bf16.mxu0 %vm2502_vm1, %v2501_v0 }
 0xdf6   :  { %2278 = vmatpush3.bf16.msra.mxu1 %v2606_v28  ;;  %2281 = vmatprep.mubr.msk.bf16.mxu1 %vm2502_vm1, %v2501_v0 }
 0xdf7   :  { %2279 = vmatprep.subr.bf16.mxu1 %v2501_v0  ;;  %2285 = vmatprep.subr.bf16.mxu0 %v2501_v0 }
 0xdfa   :  { %2280 = vmatpush3.bf16.msra.mxu1 %v2611_v29 }
 0xdfb   :  { %2293 = vmatprep.subr.bf16.mxu1 %v2501_v0 }
 0xdfc   :  { %2274 = vmatmul.mubr.msk.bf16.vlgmr.msra.gmra.mrb[40].mxu0 %vm107_vm2, %v2002_v1 }
 0xdfd   :  { %2286 = vmatpush3.bf16.msra.mxu0 %v2617_v30  ;;  %2289 = vmatprep.mubr.msk.bf16.mxu0 %vm2502_vm1, %v2501_v0 }
 0xdfe   :  { %2287 = vmatprep.subr.bf16.mxu0 %v2501_v0 }
 0xe01   :  { %2288 = vmatpush3.bf16.msra.mxu0 %v2624_v31 }
 0xe02   :  { %2301 = vmatprep.subr.bf16.mxu0 %v2501_v0 }
 0xebf   :  { %v1167_v4 = vpop.f32.mrb[36].mxu1 }
 0xec0   :  { %v2253_v23 = vpop.f32.mrb[37].mxu1 }
 0xec1   :  { %v1170_v17 = vpop.f32.mrb[38].mxu1 }
 0xec2   :  { %v2254_v24 = vpop.f32.mrb[39].mxu1 }
 0xec7   :  { %v1213_v25 = vpop.f32.mrb[36].mxu0  ;;  %v1280_v19 = vpop.f32.mrb[40].mxu1 }
 0xec8   :  { %v1214_v26 = vadd.f32 %v1213_v25, %v1167_v4  ;;  %v2261_v32 = vpop.f32.mrb[37].mxu0  ;;  %v2269_v27 = vpop.f32.mrb[41].mxu1 }
 0xec9   :  { %v1216_v33 = vpop.f32.mrb[38].mxu0  ;;  %v1283_v34 = vpop.f32.mrb[42].mxu1 }
 0xeca   :  { %v1219_v35 = vadd.f32 %v2664_v42, %v1214_v26  ;;  %v2262_v36 = vpop.f32.mrb[39].mxu0  ;;  %v2270_v37 = vpop.f32.mrb[43].mxu1  ;;  %v2914_v34 = vld [vmem:[%s3005_s3] ss:$0 sm:$0xff] }
 0xecc   :  { %2437 = vtanh.f32 %v1219_v35  ;;  %v2001_v47 = vmul.f32 -1.442695, %v1219_v35 }
 0xecf   :  { %v1323_v38 = vpop.f32.mrb[40].mxu0 }
 0xed0   :  { %v1324_v39 = vadd.f32 %v1323_v38, %v1280_v19  ;;  %v2275_v40 = vpop.f32.mrb[41].mxu0 }
 0xed1   :  { %v1326_v41 = vpop.f32.mrb[42].mxu0 }
 0xed2   :  { %v1329_v43 = vadd.f32 %v2595_v10, %v1324_v39  ;;  %v2276_v44 = vpop.f32.mrb[43].mxu0 }
 0xed4   :  { %2439 = vtanh.f32 %v1329_v43  ;;  %v2005_v48 = vmul.f32 -1.442695, %v1329_v43 }
 0xed5   :  { %2441 = vpow2.f32 %v2001_v47 }
 0xed6   :  { %v2438_v45 = vpop.eup %2437  ;;  %2443 = vpow2.f32 %v2005_v48 }
 0xed7   :  { %1229 = vrot.lane.b32.xlu0 %v2438_v45, %s2504_s18 }
 0xede   :  { %v2440_v46 = vpop.eup %2439 }
 0xedf   :  { %1339 = vrot.lane.b32.xlu1 %v2440_v46, %s2504_s18  ;;  %v2442_v49 = vpop.eup %2441 }
 0xee0   :  { %v1223_v50 = vadd.f32 1.0, %v2442_v49  ;;  %v2444_v51 = vpop.eup %2443 }
 0xee1   :  { %v1333_v52 = vadd.f32 1.0, %v2444_v51 }
 0xee2   :  { %2445 = vrcp.f32 %v1223_v50 }
 0xee3   :  { %2447 = vrcp.f32 %v1333_v52 }
 0xeec   :  { %v2446_v53 = vpop.eup %2445 }
 0xeed   :  { %v2448_v55 = vpop.eup %2447  ;;  %v1227_v58 = vmul.f32 %v2446_v53, %v2813_v6 }
 0xeee   :  { %v1337_v61 = vmul.f32 %v2448_v55, %v2817_v11 }
 0xf49   :  { %v1230_v10 = vpop.permute.xlu0 %1229 }
 0xf4a   :  { %v1232_v54 = vmul.f32 %v2446_v53, %v1230_v10 }
 0xf4c   :  { %1234 = vrot.lane.b32.xlu0 %v1232_v54, %s2505_s19 }
 0xf51   :  { %v1340_v56 = vpop.permute.xlu1 %1339 }
 0xf52   :  { %v1342_v57 = vmul.f32 %v2448_v55, %v1340_v56 }
 0xf54   :  { %1344 = vrot.lane.b32.xlu1 %v1342_v57, %s2505_s19 }
 0xfbe   :  { %v1235_v59 = vpop.permute.xlu0 %1234 }
 0xfbf   :  { %v2860_v60 = vadd.f32 %v1235_v59, %v1227_v58 }
 0xfc1   :  { %2449 = vtanh.f32 %v2860_v60 }
 0xfc6   :  { %v1345_v62 = vpop.permute.xlu1 %1344 }
 0xfc7   :  { %v2864_v63 = vadd.f32 %v1345_v62, %v1337_v61 }
 0xfc9   :  { %2451 = vtanh.f32 %v2864_v63 }
 0xfcb   :  { %v2450_v2 = vpop.eup %2449 }
 0xfcc   :  { %1240 = vrot.lane.b32.xlu0 %v2450_v2, %s2504_s18 }
 0xfd3   :  { %v2452_v5 = vpop.eup %2451 }
 0xfd4   :  { %1350 = vrot.lane.b32.xlu1 %v2452_v5, %s2504_s18 }
0x103e   :  { %v1241_v7 = vpop.permute.xlu0 %1240 }
0x103f   :  { %v1243_v6 = vmul.f32 %v2446_v53, %v1241_v7  ;;  %v2496_v7 = vld [vmem:[%s3006_s5] sm:$0xff]  }
0x1041   :  { %v1355_v8 = vpack.c.bf16 %v1243_v6, %v1243_v6  ;;  %v2016_v6 = vld [vmem:[%s3004_s0 + $0x1c] sm:$0xf] }
0x1043   :  { %1357 = vrot.lane.b32.xlu0 %v1355_v8, %s2505_s19  ;;  %v2498_v8 = vld [vmem:[%s3007_s4] sm:$0xff]  }
0x1046   :  { %v1351_v12 = vpop.permute.xlu1 %1350 }
0x1047   :  { %v1353_v15 = vmul.f32 %v2448_v55, %v1351_v12  ;;  %v2499_v12 = vld [vmem:[%s3007_s4 + $0x8] sm:$0xff]  }
0x1049   :  { %v1354_v18 = vpack.c.bf16 %v1353_v15, %v1353_v15 }
0x104b   :  { %1403 = vrot.lane.b32.xlu1 %v1354_v18, %s2505_s19 }
0x10b5   :  { %v1358_v11 = vpop.permute.xlu0 %1357 }
0x10b6   :  { %2282 = vmatmul.mubr.msk.bf16.vlgmr.msra.gmra.mrb[44].mxu1 %vm63_vm3, %v1358_v11 }
0x10b7   :  { %2294 = vmatpush3.bf16.msra.mxu1 %v2875_v9  ;;  %2297 = vmatprep.mubr.msk.bf16.mxu1 %vm2502_vm1, %v2501_v0 }
0x10b8   :  { %2295 = vmatprep.subr.bf16.mxu1 %v2501_v0 }
0x10bb   :  { %2296 = vmatpush3.bf16.msra.mxu1 %v2884_v20 }
0x10bc   :  { %2307 = vmatprep.subr.bf16.mxu1 %v2501_v0 }
0x10bd   :  { %v1404_v13 = vpop.permute.xlu1 %1403 }
0x10be   :  { %2290 = vmatmul.mubr.msk.bf16.vlgmr.msra.gmra.mrb[44].mxu0 %vm63_vm3, %v1404_v13  ;;  %2298 = vmatmul.mubr.msk.bf16.vlgmr.msra.gmra.mrb[48].mxu1 %vm63_vm3, %v1404_v13 }
0x10bf   :  { %2302 = vmatpush3.bf16.msra.mxu0 %v2572_v3  ;;  %2303 = vmatprep.mubr.msk.bf16.mxu0 %vm2502_vm1, %v2501_v0 }
0x10c0   :  { %2308 = vmatpush3.bf16.msra.mxu1 %v2606_v28  ;;  %2311 = vmatprep.mubr.msk.bf16.mxu1 %vm2502_vm1, %v2501_v0 }
0x10c1   :  { %2309 = vmatprep.subr.bf16.mxu1 %v2501_v0  ;;  %2315 = vmatprep.subr.bf16.mxu0 %v2501_v0 }
0x10c4   :  { %2310 = vmatpush3.bf16.msra.mxu1 %v2611_v29 }
0x10c5   :  { %2323 = vmatprep.subr.bf16.mxu1 %v2501_v0 }
0x10c6   :  { %2304 = vmatmul.mubr.msk.bf16.vlgmr.msra.gmra.mrb[48].mxu0 %vm107_vm2, %v2009_v21 }
0x10c7   :  { %2316 = vmatpush3.bf16.msra.mxu0 %v2617_v30  ;;  %2319 = vmatprep.mubr.msk.bf16.mxu0 %vm2502_vm1, %v2501_v0 }
0x10c8   :  { %2317 = vmatprep.subr.bf16.mxu0 %v2501_v0 }
0x10cb   :  { %2318 = vmatpush3.bf16.msra.mxu0 %v2624_v31 }
0x10cc   :  { %2331 = vmatprep.subr.bf16.mxu0 %v2501_v0 }
0x1189   :  { %v1396_v28 = vpop.f32.mrb[44].mxu1 }
0x118a   :  { %v2283_v16 = vpop.f32.mrb[45].mxu1 }
0x118b   :  { %v1399_v14 = vpop.f32.mrb[46].mxu1 }
0x118c   :  { %v2284_v22 = vpop.f32.mrb[47].mxu1 }
0x1191   :  { %v1442_v29 = vpop.f32.mrb[44].mxu0  ;;  %v1509_v1 = vpop.f32.mrb[48].mxu1 }
0x1192   :  { %v1443_v4 = vadd.f32 %v1442_v29, %v1396_v28  ;;  %v2291_v23 = vpop.f32.mrb[45].mxu0  ;;  %v2299_v17 = vpop.f32.mrb[49].mxu1 }
0x1193   :  { %v1445_v24 = vpop.f32.mrb[46].mxu0  ;;  %v1512_v30 = vpop.f32.mrb[50].mxu1 }
0x1194   :  { %v1448_v25 = vadd.f32 %v2664_v42, %v1443_v4  ;;  %v2292_v19 = vpop.f32.mrb[47].mxu0  ;;  %v2300_v26 = vpop.f32.mrb[51].mxu1 }
0x1196   :  { %2453 = vtanh.f32 %v1448_v25  ;;  %v2008_v38 = vmul.f32 -1.442695, %v1448_v25 }
0x1199   :  { %v1552_v32 = vpop.f32.mrb[48].mxu0 }
0x119a   :  { %v1553_v31 = vadd.f32 %v1552_v32, %v1509_v1  ;;  %v2305_v27 = vpop.f32.mrb[49].mxu0 }
0x119b   :  { %v1555_v33 = vpop.f32.mrb[50].mxu0 }
0x119c   :  { %v1558_v35 = vadd.f32 %v2914_v34, %v1553_v31  ;;  %v2306_v36 = vpop.f32.mrb[51].mxu0 }
0x119e   :  { %2455 = vtanh.f32 %v1558_v35  ;;  %v2012_v39 = vmul.f32 -1.442695, %v1558_v35 }
0x119f   :  { %2457 = vpow2.f32 %v2008_v38 }
0x11a0   :  { %v2454_v37 = vpop.eup %2453  ;;  %2459 = vpow2.f32 %v2012_v39 }
0x11a1   :  { %1458 = vrot.lane.b32.xlu0 %v2454_v37, %s2504_s18 }
0x11a8   :  { %v2456_v42 = vpop.eup %2455 }
0x11a9   :  { %1568 = vrot.lane.b32.xlu1 %v2456_v42, %s2504_s18  ;;  %v2458_v40 = vpop.eup %2457 }
0x11aa   :  { %v1452_v41 = vadd.f32 1.0, %v2458_v40  ;;  %v2460_v43 = vpop.eup %2459 }
0x11ab   :  { %v1562_v44 = vadd.f32 1.0, %v2460_v43 }
0x11ac   :  { %2461 = vrcp.f32 %v1452_v41 }
0x11ad   :  { %2463 = vrcp.f32 %v1562_v44 }
0x11b6   :  { %v2462_v45 = vpop.eup %2461 }
0x11b7   :  { %v2464_v48 = vpop.eup %2463  ;;  %v1456_v51 = vmul.f32 %v2462_v45, %v2860_v60 }
0x11b8   :  { %v1566_v10 = vmul.f32 %v2464_v48, %v2864_v63 }
0x1213   :  { %v1459_v46 = vpop.permute.xlu0 %1458 }
0x1214   :  { %v1461_v47 = vmul.f32 %v2462_v45, %v1459_v46 }
0x1216   :  { %1463 = vrot.lane.b32.xlu0 %v1461_v47, %s2505_s19 }
0x121b   :  { %v1569_v49 = vpop.permute.xlu1 %1568 }
0x121c   :  { %v1571_v50 = vmul.f32 %v2464_v48, %v1569_v49 }
0x121e   :  { %1573 = vrot.lane.b32.xlu1 %v1571_v50, %s2505_s19 }
0x1288   :  { %v1464_v52 = vpop.permute.xlu0 %1463 }
0x1289   :  { %v2922_v53 = vadd.f32 %v1464_v52, %v1456_v51 }
0x128b   :  { %2465 = vtanh.f32 %v2922_v53 }
0x1290   :  { %v1574_v54 = vpop.permute.xlu1 %1573 }
0x1291   :  { %v2926_v55 = vadd.f32 %v1574_v54, %v1566_v10 }
0x1293   :  { %2467 = vtanh.f32 %v2926_v55 }
0x1295   :  { %v2466_v56 = vpop.eup %2465 }
0x1296   :  { %1469 = vrot.lane.b32.xlu0 %v2466_v56, %s2504_s18 }
0x129d   :  { %v2468_v57 = vpop.eup %2467 }
0x129e   :  { %1579 = vrot.lane.b32.xlu1 %v2468_v57, %s2504_s18 }
0x1308   :  { %v1470_v58 = vpop.permute.xlu0 %1469 }
0x1309   :  { %v1472_v59 = vmul.f32 %v2462_v45, %v1470_v58 }
0x130b   :  { %v1584_v60 = vpack.c.bf16 %v1472_v59, %v1472_v59 }
0x130d   :  { %1586 = vrot.lane.b32.xlu0 %v1584_v60, %s2505_s19 }
0x1310   :  { %v1580_v61 = vpop.permute.xlu1 %1579 }
0x1311   :  { %v1582_v62 = vmul.f32 %v2464_v48, %v1580_v61 }
0x1313   :  { %v1583_v2 = vpack.c.bf16 %v1582_v62, %v1582_v62 }
0x1315   :  { %1632 = vrot.lane.b32.xlu1 %v1583_v2, %s2505_s19 }
0x137f   :  { %v1587_v63 = vpop.permute.xlu0 %1586 }
0x1380   :  { %2312 = vmatmul.mubr.msk.bf16.vlgmr.msra.gmra.mrb[52].mxu1 %vm63_vm3, %v1587_v63 }
0x1381   :  { %2324 = vmatpush3.bf16.msra.mxu1 %v2875_v9  ;;  %2327 = vmatprep.mubr.msk.bf16.mxu1 %vm2502_vm1, %v2501_v0 }
0x1382   :  { %2325 = vmatprep.subr.bf16.mxu1 %v2501_v0 }
0x1385   :  { %2326 = vmatpush3.bf16.msra.mxu1 %v2884_v20 }
0x1386   :  { %2337 = vmatprep.subr.bf16.mxu1 %v2501_v0 }
0x1387   :  { %v1633_v5 = vpop.permute.xlu1 %1632 }
0x1388   :  { %2320 = vmatmul.mubr.msk.bf16.vlgmr.msra.gmra.mrb[52].mxu0 %vm63_vm3, %v1633_v5  ;;  %2328 = vmatmul.mubr.msk.bf16.vlgmr.msra.gmra.mrb[56].mxu1 %vm63_vm3, %v1633_v5 }
0x1389   :  { %2332 = vmatpush3.bf16.msra.mxu0 %v2572_v3  ;;  %2333 = vmatprep.mubr.msk.bf16.mxu0 %vm2502_vm1, %v2501_v0  ;;  %v2497_v3 = vld [vmem:[%s3006_s5 + $0x8] sm:$0xff]  }
0x138a   :  { %2338 = vmatpush3.bf16.msra.mxu1 %v2496_v7  ;;  %2341 = vmatprep.mubr.msk.bf16.mxu1 %vm2502_vm1, %v2501_v0 }
0x138b   :  { %2339 = vmatprep.subr.bf16.mxu1 %v2501_v0  ;;  %2345 = vmatprep.subr.bf16.mxu0 %v2501_v0 }
0x138e   :  { %2340 = vmatpush3.bf16.msra.mxu1 %v2497_v3 }
0x1390   :  { %2334 = vmatmul.mubr.msk.bf16.vlgmr.msra.gmra.mrb[56].mxu0 %vm107_vm2, %v2016_v6 }
0x1391   :  { %2346 = vmatpush3.bf16.msra.mxu0 %v2498_v8  ;;  %2349 = vmatprep.mubr.msk.bf16.mxu0 %vm2502_vm1, %v2501_v0 }
0x1392   :  { %2347 = vmatprep.subr.bf16.mxu0 %v2501_v0  ;;  %v2971_v0 = vld [vmem:[%s3008_s6] ss:$0 sm:$0xff] }
0x1395   :  { %2348 = vmatpush3.bf16.msra.mxu0 %v2499_v12 }
0x1453   :  { %v1625_v15 = vpop.f32.mrb[52].mxu1 }
0x1454   :  { %v2313_v18 = vpop.f32.mrb[53].mxu1 }
0x1455   :  { %v1628_v11 = vpop.f32.mrb[54].mxu1 }
0x1456   :  { %v2314_v9 = vpop.f32.mrb[55].mxu1 }
0x145b   :  { %v1671_v20 = vpop.f32.mrb[52].mxu0  ;;  %v1738_v13 = vpop.f32.mrb[56].mxu1 }
0x145c   :  { %v1672_v21 = vadd.f32 %v1671_v20, %v1625_v15  ;;  %v2321_v28 = vpop.f32.mrb[53].mxu0  ;;  %v2329_v16 = vpop.f32.mrb[57].mxu1  ;;  %v2023_v20 = vld [vmem:[%s3009_s7] ss:$0 sm:$0xff] }
0x145d   :  { %v1674_v14 = vpop.f32.mrb[54].mxu0  ;;  %v1741_v22 = vpop.f32.mrb[58].mxu1 }
0x145e   :  { %v1677_v29 = vadd.f32 %v2971_v0, %v1672_v21  ;;  %v2322_v1 = vpop.f32.mrb[55].mxu0  ;;  %v2330_v4 = vpop.f32.mrb[59].mxu1  ;;  %v14_v14 = vstv %s3010_s8 }
0x145f   :  { %15 = vst [vmem:[#allocation2] sm:$0x1] %v14_v14 }
0x1460   :  { %2469 = vtanh.f32 %v1677_v29  ;;  %v2015_v31 = vmul.f32 -1.442695, %v1677_v29 }
0x1463   :  { %v1781_v23 = vpop.f32.mrb[56].mxu0 }
0x1464   :  { %v1782_v17 = vadd.f32 %v1781_v23, %v1738_v13  ;;  %v2335_v24 = vpop.f32.mrb[57].mxu0 }
0x1465   :  { %v1784_v30 = vpop.f32.mrb[58].mxu0 }
0x1466   :  { %v1787_v25 = vadd.f32 %v2914_v34, %v1782_v17  ;;  %v2336_v19 = vpop.f32.mrb[59].mxu0  ;;  %v2024_v17 = vld [vmem:[#allocation2] ss:$0 sm:$0xff] }
0x1468   :  { %2471 = vtanh.f32 %v1787_v25  ;;  %v2019_v27 = vmul.f32 -1.442695, %v1787_v25 }
0x1469   :  { %2473 = vpow2.f32 %v2015_v31 }
0x146a   :  { %v2470_v26 = vpop.eup %2469  ;;  %2475 = vpow2.f32 %v2019_v27 }
0x146b   :  { %1687 = vrot.lane.b32.xlu0 %v2470_v26, %s2504_s18 }
0x1472   :  { %v2472_v32 = vpop.eup %2471 }
0x1473   :  { %1797 = vrot.lane.b32.xlu1 %v2472_v32, %s2504_s18  ;;  %v2474_v33 = vpop.eup %2473 }
0x1474   :  { %v1681_v35 = vadd.f32 1.0, %v2474_v33  ;;  %v2476_v36 = vpop.eup %2475 }
0x1475   :  { %v1791_v37 = vadd.f32 1.0, %v2476_v36 }
0x1476   :  { %2477 = vrcp.f32 %v1681_v35 }
0x1477   :  { %2479 = vrcp.f32 %v1791_v37 }
0x1480   :  { %v2478_v42 = vpop.eup %2477 }
0x1481   :  { %v2480_v39 = vpop.eup %2479  ;;  %v1685_v43 = vmul.f32 %v2478_v42, %v2922_v53 }
0x1482   :  { %v1795_v46 = vmul.f32 %v2480_v39, %v2926_v55 }
0x14dd   :  { %v1688_v34 = vpop.permute.xlu0 %1687 }
0x14de   :  { %v1690_v38 = vmul.f32 %v2478_v42, %v1688_v34 }
0x14e0   :  { %1692 = vrot.lane.b32.xlu0 %v1690_v38, %s2505_s19 }
0x14e5   :  { %v1798_v40 = vpop.permute.xlu1 %1797 }
0x14e6   :  { %v1800_v41 = vmul.f32 %v2480_v39, %v1798_v40 }
0x14e8   :  { %1802 = vrot.lane.b32.xlu1 %v1800_v41, %s2505_s19 }
0x1552   :  { %v1693_v44 = vpop.permute.xlu0 %1692 }
0x1553   :  { %v1695_v45 = vadd.f32 %v1693_v44, %v1685_v43 }
0x1555   :  { %2481 = vtanh.f32 %v1695_v45 }
0x155a   :  { %v1803_v47 = vpop.permute.xlu1 %1802 }
0x155b   :  { %v1805_v48 = vadd.f32 %v1803_v47, %v1795_v46 }
0x155d   :  { %2483 = vtanh.f32 %v1805_v48 }
0x155f   :  { %v2482_v49 = vpop.eup %2481 }
0x1560   :  { %1698 = vrot.lane.b32.xlu0 %v2482_v49, %s2504_s18 }
0x1567   :  { %v2484_v50 = vpop.eup %2483 }
0x1568   :  { %1808 = vrot.lane.b32.xlu1 %v2484_v50, %s2504_s18 }
0x15d2   :  { %v1699_v51 = vpop.permute.xlu0 %1698 }
0x15d3   :  { %v1701_v52 = vmul.f32 %v2478_v42, %v1699_v51 }
0x15d5   :  { %v1813_v10 = vpack.c.bf16 %v1701_v52, %v1701_v52 }
0x15d7   :  { %1815 = vrot.lane.b32.xlu0 %v1813_v10, %s2505_s19 }
0x15da   :  { %v1809_v53 = vpop.permute.xlu1 %1808 }
0x15db   :  { %v1811_v54 = vmul.f32 %v2480_v39, %v1809_v53 }
0x15dd   :  { %v1812_v56 = vpack.c.bf16 %v1811_v54, %v1811_v54 }
0x15df   :  { %1861 = vrot.lane.b32.xlu1 %v1812_v56, %s2505_s19 }
0x1649   :  { %v1816_v55 = vpop.permute.xlu0 %1815 }
0x164a   :  { %2342 = vmatmul.mubr.msk.bf16.vlgmr.msra.gmra.mrb[60].mxu1 %vm63_vm3, %v1816_v55 }
0x1651   :  { %v1862_v57 = vpop.permute.xlu1 %1861 }
0x1652   :  { %2350 = vmatmul.mubr.msk.bf16.vlgmr.msra.gmra.mrb[60].mxu0 %vm63_vm3, %v1862_v57 }
0x171d   :  { %v1854_v58 = vpop.f32.mrb[60].mxu1 }
0x171e   :  { %v2343_v59 = vpop.f32.mrb[61].mxu1 }
0x171f   :  { %v1857_v60 = vpop.f32.mrb[62].mxu1 }
0x1720   :  { %v2344_v61 = vpop.f32.mrb[63].mxu1 }
0x1725   :  { %v1900_v62 = vpop.f32.mrb[60].mxu0 }
0x1726   :  { %v1901_v2 = vadd.f32 %v1900_v62, %v1854_v58  ;;  %v2351_v63 = vpop.f32.mrb[61].mxu0 }
0x1727   :  { %v1903_v5 = vpop.f32.mrb[62].mxu0 }
0x1728   :  { %v1906_v7 = vadd.f32 %v2971_v0, %v1901_v2  ;;  %v2352_v6 = vpop.f32.mrb[63].mxu0 }
0x172a   :  { %2485 = vtanh.f32 %v1906_v7  ;;  %v2022_v8 = vmul.f32 -1.442695, %v1906_v7 }
0x172c   :  { %2487 = vpow2.f32 %v2022_v8 }
0x1734   :  { %v2486_v3 = vpop.eup %2485 }
0x1735   :  { %1916 = vrot.lane.b32.xlu0 %v2486_v3, %s2504_s18 }
0x1736   :  { %v2488_v12 = vpop.eup %2487 }
0x1737   :  { %v1910_v15 = vadd.f32 1.0, %v2488_v12 }
0x1739   :  { %2489 = vrcp.f32 %v1910_v15 }
0x1743   :  { %v2490_v18 = vpop.eup %2489 }
0x1744   :  { %v1914_v13 = vmul.f32 %v2490_v18, %v1695_v45 }
0x17a7   :  { %v1917_v11 = vpop.permute.xlu0 %1916 }
0x17a8   :  { %v1919_v9 = vmul.f32 %v2490_v18, %v1917_v11 }
0x17aa   :  { %1921 = vrot.lane.b32.xlu1 %v1919_v9, %s2505_s19 }
0x17ae   :  { %1938 = vrot.lane.b32.xlu1 %v2023_v20, %s2506_s1 }
0x181c   :  { %v1922_v21 = vpop.permute.xlu1 %1921 }
0x181d   :  { %v1924_v28 = vadd.f32 %v1922_v21, %v1914_v13 }
0x181f   :  { %2491 = vtanh.f32 %v1924_v28 }
0x1820   :  { %v1939_v0 = vpop.permute.xlu1 %1938 }
0x1829   :  { %v2492_v16 = vpop.eup %2491 }
0x182a   :  { %1927 = vrot.lane.b32.xlu0 %v2492_v16, %s2504_s18 }
0x189c   :  { %v1928_v22 = vpop.permute.xlu0 %1927 }
0x189d   :  { %v1930_v29 = vmul.f32 %v2490_v18, %v1928_v22 }
0x189f   :  { %v1941_v1 = vmul.f32 %v1939_v0, %v1930_v29 }
0x18a1   :  { %1943 = vrot.lane.b32.xlu0 %v1941_v1, %s2505_s19 }
0x1913   :  { %v1944_v4 = vpop.permute.xlu0 %1943 }
0x1914   :  { %v1946_v23 = vsel %vm63_vm3, %v1944_v4, 0.0 }
0x1915   :  { %1947 = vadd.xlane.f32.xlu1 %v1946_v23 }
0x19a2   :  { %v1948_v24 = vpop.xlane.xlu1 %1947 }
0x19a3   :  { %v1955_v30 = vadd.f32 %v2024_v17, %v1948_v24 }
0x19a5   :  { %1957 = vst.msk [vmem:[%s3011_s9] sm:$0xff] %vm1956_vm4, %v1955_v30 }

</bundles_post_ra>
